<compile_context>
chip_gen: v6e
topology: v6e:2x2x1
jax: 0.10.0
libtpu: 0.0.40
codegen_flags: <defaults>
</compile_context>

<pallas_src>
import math

import jax
import jax.numpy as jnp
from jax import lax
from jax.experimental import pallas as pl
from jax.experimental.pallas import tpu as pltpu


def _layernorm(y, gamma, beta, eps=1e-5):
    # f32 elementwise math (keeps v5e VPU/EUP on the native f32 path).
    mu = jnp.mean(y, axis=-1, keepdims=True)
    var = jnp.mean((y - mu) ** 2, axis=-1, keepdims=True)
    return (y - mu) * lax.rsqrt(var + eps) * gamma + beta


def _make_kernel(num_heads, block_b, seq_len, d_model):
    H, S, D = num_heads, seq_len, d_model
    dk = D // H
    G = H * block_b          # fused (head, sequence) batch axis
    M = block_b * S          # rows handled per grid step

    def encoder_layer_kernel(
        x_ref, bias_ref,
        wqkv_ref, bqkv_ref, wo_ref, bo_ref,
        w1_ref, b1_ref, w2_ref, b2_ref,
        g1_ref, be1_ref, g2_ref, be2_ref,
        o_ref,
    ):
        xf = x_ref[...]                       # (M, D) f32 -- residual path
        xb = xf.astype(jnp.bfloat16)          # bf16 MXU operand

        # ---- fused QKV projection: one wide MXU matmul (N = 3D) ----
        # (1/sqrt(dk) already folded into the Q columns/bias by the wrapper.)
        qkv = jnp.dot(xb, wqkv_ref[...],
                      preferred_element_type=jnp.float32) + bqkv_ref[...]

        # ---- split heads ONCE onto a leading batch axis (no per-b/h loop) ----
        heads = jnp.stack(
            [qkv[:, g * D + h * dk: g * D + (h + 1) * dk]
             for g in range(3) for h in range(H)], axis=0)      # (3H, M, dk) f32
        q = heads[0 * H:1 * H].reshape(G, S, dk).astype(jnp.bfloat16)
        k = heads[1 * H:2 * H].reshape(G, S, dk).astype(jnp.bfloat16)
        v = heads[2 * H:3 * H].reshape(G, S, dk).astype(jnp.bfloat16)

        # ---- batched attention over the fused (head, sequence) axis ----
        s = jnp.einsum("gqd,gkd->gqk", q, k,
                       preferred_element_type=jnp.float32)       # (G, S, S) f32
        # Additive mask bias, hoisted: one broadcast + one add for all heads.
        bias = jnp.broadcast_to(bias_ref[...][None],
                                (H, block_b, 1, S)).reshape(G, 1, S)
        s = s + bias
        m = jnp.max(s, axis=-1, keepdims=True)
        e = jnp.exp(s - m)                                       # f32 (EUP)
        p = e * pl.reciprocal(jnp.sum(e, axis=-1, keepdims=True), approx=True)
        ctx = jnp.einsum("gqk,gkd->gqd", p.astype(jnp.bfloat16), v,
                         preferred_element_type=jnp.float32)     # (G, S, dk)

        # ---- output projection with the head concat folded into Wo ----
        ctx_h = ctx.reshape(H, M, dk).astype(jnp.bfloat16)        # (H, M, dk)
        attn = jnp.einsum("hmd,hdn->hmn", ctx_h, wo_ref[...],
                          preferred_element_type=jnp.float32)     # (H, M, D)
        attn = jnp.sum(attn, axis=0) + bo_ref[...]                # (M, D) f32

        # ---- Add & Norm 1 (dropout = identity) ----
        x1 = _layernorm(xf + attn, g1_ref[...], be1_ref[...])

        # ---- position-wise feed-forward (bf16 MXU operands, f32 accum) ----
        h1 = jnp.dot(x1.astype(jnp.bfloat16), w1_ref[...],
                     preferred_element_type=jnp.float32) + b1_ref[...]
        h1 = jnp.maximum(h1, 0.0)
        ff = jnp.dot(h1.astype(jnp.bfloat16), w2_ref[...],
                     preferred_element_type=jnp.float32) + b2_ref[...]

        # ---- Add & Norm 2 (dropout = identity) ----
        o_ref[...] = _layernorm(x1 + ff, g2_ref[...], be2_ref[...]).astype(o_ref.dtype)

    return encoder_layer_kernel


def _tpu_config():
    """Generation-aware tiling / VMEM budget / minimum grid steps."""
    kind = ""
    try:
        kind = jax.devices()[0].device_kind.lower()
    except Exception:
        pass
    if "v7" in kind:   # 2 TensorCores/chip, 64 MiB VMEM, 256-wide MXU
        return {"target_rows": 256, "vmem_limit": 48 * 1024 * 1024, "min_steps": 2}
    if "v6" in kind:   # 1 TC, 128 MiB VMEM, 256-wide MXU
        return {"target_rows": 256, "vmem_limit": 96 * 1024 * 1024, "min_steps": 1}
    if "v5" in kind:   # 1 TC, 128 MiB VMEM, 128-wide MXU
        return {"target_rows": 128, "vmem_limit": 96 * 1024 * 1024, "min_steps": 1}
    return {"target_rows": 128, "vmem_limit": 64 * 1024 * 1024, "min_steps": 1}


def encoder_layer(x, mask, params, num_heads, block_b=None):
    """x: (B, S, D) f32, mask: (B, S) (1 = keep, 0 = mask out)."""
    B, S, D = x.shape
    H = num_heads
    dk = D // H
    F = params["w1"].shape[-1]
    cfg = _tpu_config()

    if block_b is None:
        # Fatter grid steps for MXU fill, but keep >= min_steps steps so both
        # v7x TensorCores get work under dimension_semantics=("parallel",).
        max_bb = max(1, B // cfg["min_steps"])
        block_b = max(1, min(max_bb, -(-cfg["target_rows"] // S)))
        while B % block_b:
            block_b -= 1
    grid = (B // block_b,)
    M = block_b * S

    scale = 1.0 / math.sqrt(dk)
    # Fused QKV weight; 1/sqrt(dk) folded into the Q columns and bias.
    wqkv = jnp.concatenate(
        [params["wq"] * scale, params["wk"], params["wv"]], axis=1
    ).astype(jnp.bfloat16)                                           # (D, 3D)
    bqkv = jnp.concatenate(
        [params["bq"] * scale, params["bk"], params["bv"]], axis=1)  # (1, 3D) f32
    wo_h = params["wo"].reshape(H, dk, D).astype(jnp.bfloat16)       # per-head slabs
    w1 = params["w1"].astype(jnp.bfloat16)
    w2 = params["w2"].astype(jnp.bfloat16)
    # Additive attention bias per sequence (mask select hoisted out of kernel).
    attn_bias = ((mask.astype(jnp.float32) - 1.0) * 1e9).reshape(B, 1, S)

    xf = x.reshape(B * S, D).astype(jnp.float32)   # f32 rows -> exact residuals

    def build(weights_buffered):
        def wspec(shape):
            idx = lambda i, n=len(shape): (0,) * n
            if weights_buffered:
                # Grid-invariant weights never change block index; single-buffer
                # them to halve their VMEM footprint (matters on v7x's 64 MiB).
                return pl.BlockSpec(shape, idx, pipeline_mode=pl.Buffered(1))
            return pl.BlockSpec(shape, idx)

        in_specs = [
            pl.BlockSpec((M, D), lambda i: (i, 0)),              # x rows
            pl.BlockSpec((block_b, 1, S), lambda i: (i, 0, 0)),  # additive mask bias
            wspec((D, 3 * D)), wspec((1, 3 * D)),                # wqkv, bqkv
            wspec((H, dk, D)), wspec((1, D)),                    # wo (per head), bo
            wspec((D, F)), wspec((1, F)),                        # w1, b1
            wspec((F, D)), wspec((1, D)),                        # w2, b2
            wspec((1, D)), wspec((1, D)),                        # gamma1, beta1
            wspec((1, D)), wspec((1, D)),                        # gamma2, beta2
        ]
        return pl.pallas_call(
            _make_kernel(H, block_b, S, D),
            out_shape=jax.ShapeDtypeStruct((B * S, D), jnp.float32),
            grid=grid,
            in_specs=in_specs,
            out_specs=pl.BlockSpec((M, D), lambda i: (i, 0)),
            compiler_params=pltpu.CompilerParams(
                dimension_semantics=("parallel",),
                vmem_limit_bytes=cfg["vmem_limit"]),
        )

    args = (xf, attn_bias, wqkv, bqkv, wo_h, params["bo"],
            w1, params["b1"], w2, params["b2"],
            params["g1"], params["be1"], params["g2"], params["be2"])

    try:
        out = build(weights_buffered=hasattr(pl, "Buffered"))(*args)
    except Exception:
        # Fall back to default (double-buffered) weight specs if Buffered(1)
        # is rejected by this JAX/Mosaic build.
        out = build(weights_buffered=False)(*args)
    return out.reshape(B, S, D)


def encoder_layer_ref(x, mask, params, num_heads):
    """Pure-JAX f32 reference (eval-mode forward)."""
    B, S, D = x.shape
    H = num_heads
    dk = D // H

    def split(t):
        return t.reshape(B, S, H, dk).transpose(0, 2, 1, 3)

    q = split(x @ params["wq"] + params["bq"])
    k = split(x @ params["wk"] + params["bk"])
    v = split(x @ params["wv"] + params["bv"])
    scores = jnp.einsum("bhqd,bhkd->bhqk", q, k) / math.sqrt(dk)
    scores = jnp.where(mask[:, None, None, :] < 0.5, -1e9, scores)
    p = jax.nn.softmax(scores, axis=-1)
    ctx = jnp.einsum("bhqk,bhkd->bhqd", p, v).transpose(0, 2, 1, 3).reshape(B, S, D)
    attn_out = ctx @ params["wo"] + params["bo"]

    def ln(y, g, b, eps=1e-5):
        mu = y.mean(-1, keepdims=True)
        var = ((y - mu) ** 2).mean(-1, keepdims=True)
        return (y - mu) / jnp.sqrt(var + eps) * g + b

    x1 = ln(x + attn_out, params["g1"], params["be1"])
    h1 = jnp.maximum(x1 @ params["w1"] + params["b1"], 0.0)
    ff = h1 @ params["w2"] + params["b2"]
    return ln(x1 + ff, params["g2"], params["be2"])


def init_params(key, d_model, d_ff):
    ks = jax.random.split(key, 6)
    s = 0.02
    return {
        "wq": s * jax.random.normal(ks[0], (d_model, d_model), jnp.float32),
        "wk": s * jax.random.normal(ks[1], (d_model, d_model), jnp.float32),
        "wv": s * jax.random.normal(ks[2], (d_model, d_model), jnp.float32),
        "wo": s * jax.random.normal(ks[3], (d_model, d_model), jnp.float32),
        "w1": s * jax.random.normal(ks[4], (d_model, d_ff), jnp.float32),
        "w2": s * jax.random.normal(ks[5], (d_ff, d_model), jnp.float32),
        "bq": jnp.zeros((1, d_model), jnp.float32),
        "bk": jnp.zeros((1, d_model), jnp.float32),
        "bv": jnp.zeros((1, d_model), jnp.float32),
        "bo": jnp.zeros((1, d_model), jnp.float32),
        "b1": jnp.zeros((1, d_ff), jnp.float32),
        "b2": jnp.zeros((1, d_model), jnp.float32),
        "g1": jnp.ones((1, d_model), jnp.float32),
        "be1": jnp.zeros((1, d_model), jnp.float32),
        "g2": jnp.ones((1, d_model), jnp.float32),
        "be2": jnp.zeros((1, d_model), jnp.float32),
    }


if __name__ == "__main__":
    B, S, D, H, F = 2, 8, 32, 4, 64
    key = jax.random.PRNGKey(0)
    kx, kp = jax.random.split(key, 2)

    x = jax.random.normal(kx, (B, S, D), jnp.float32)
    # mask: 1 = attend, 0 = masked (last two keys of batch 1 masked out)
    mask = jnp.ones((B, S), jnp.float32).at[1, -2:].set(0.0)
    params = init_params(kp, D, F)

    out = encoder_layer(x, mask, params, num_heads=H)
    jax.block_until_ready(out)
    assert out.shape == (B, S, D)
    assert bool(jnp.isfinite(out).all())

    ref = encoder_layer_ref(x, mask, params, H)
    max_err = float(jnp.max(jnp.abs(out - ref)))
    assert max_err < 1e-1, f"max abs err {max_err}"

    print("KERNEL_OK")
</pallas_src>

<mosaic_0001>
module attributes {stable_mosaic.version = 11 : i64} {
  func.func @encoder_layer_kernel(%arg0: i32, %arg1: memref<16x32xf32, #tpu.memory_space<vmem>>, %arg2: memref<2x1x8xf32, #tpu.memory_space<vmem>>, %arg3: memref<32x96xbf16, #tpu.memory_space<vmem>>, %arg4: memref<1x96xf32, #tpu.memory_space<vmem>>, %arg5: memref<4x8x32xbf16, #tpu.memory_space<vmem>>, %arg6: memref<1x32xf32, #tpu.memory_space<vmem>>, %arg7: memref<32x64xbf16, #tpu.memory_space<vmem>>, %arg8: memref<1x64xf32, #tpu.memory_space<vmem>>, %arg9: memref<64x32xbf16, #tpu.memory_space<vmem>>, %arg10: memref<1x32xf32, #tpu.memory_space<vmem>>, %arg11: memref<1x32xf32, #tpu.memory_space<vmem>>, %arg12: memref<1x32xf32, #tpu.memory_space<vmem>>, %arg13: memref<1x32xf32, #tpu.memory_space<vmem>>, %arg14: memref<1x32xf32, #tpu.memory_space<vmem>>, %arg15: memref<16x32xf32, #tpu.memory_space<vmem>>) attributes {dimension_semantics = [#tpu.dimension_semantics<parallel>], iteration_bounds = array<i64: 1>, scalar_prefetch = 0 : i64, scratch_operands = 0 : i64, tpu.core_type = #tpu.core_type<tc>, window_params = [{transform_indices = @transform_0, window_bounds = array<i64: 16, 32>}, {transform_indices = @transform_1, window_bounds = array<i64: 2, 1, 8>}, {pipeline_mode = #tpu.pipeline_mode<synchronous>, transform_indices = @transform_2, window_bounds = array<i64: 32, 96>}, {pipeline_mode = #tpu.pipeline_mode<synchronous>, transform_indices = @transform_3, window_bounds = array<i64: 1, 96>}, {pipeline_mode = #tpu.pipeline_mode<synchronous>, transform_indices = @transform_4, window_bounds = array<i64: 4, 8, 32>}, {pipeline_mode = #tpu.pipeline_mode<synchronous>, transform_indices = @transform_5, window_bounds = array<i64: 1, 32>}, {pipeline_mode = #tpu.pipeline_mode<synchronous>, transform_indices = @transform_6, window_bounds = array<i64: 32, 64>}, {pipeline_mode = #tpu.pipeline_mode<synchronous>, transform_indices = @transform_7, window_bounds = array<i64: 1, 64>}, {pipeline_mode = #tpu.pipeline_mode<synchronous>, transform_indices = @transform_8, window_bounds = array<i64: 64, 32>}, {pipeline_mode = #tpu.pipeline_mode<synchronous>, transform_indices = @transform_9, window_bounds = array<i64: 1, 32>}, {pipeline_mode = #tpu.pipeline_mode<synchronous>, transform_indices = @transform_10, window_bounds = array<i64: 1, 32>}, {pipeline_mode = #tpu.pipeline_mode<synchronous>, transform_indices = @transform_11, window_bounds = array<i64: 1, 32>}, {pipeline_mode = #tpu.pipeline_mode<synchronous>, transform_indices = @transform_12, window_bounds = array<i64: 1, 32>}, {pipeline_mode = #tpu.pipeline_mode<synchronous>, transform_indices = @transform_13, window_bounds = array<i64: 1, 32>}, {transform_indices = @transform_14, window_bounds = array<i64: 16, 32>}]} {
    %c0 = arith.constant 0 : index
    %c0_0 = arith.constant 0 : index
    %0 = vector.load %arg1[%c0, %c0_0] : memref<16x32xf32, #tpu.memory_space<vmem>>, vector<16x32xf32>
    %1 = arith.truncf %0 : vector<16x32xf32> to vector<16x32xbf16>
    %c0_1 = arith.constant 0 : index
    %c0_2 = arith.constant 0 : index
    %2 = vector.load %arg3[%c0_1, %c0_2] : memref<32x96xbf16, #tpu.memory_space<vmem>>, vector<32x96xbf16>
    %cst = arith.constant dense<0.000000e+00> : vector<16x96xf32>
    %3 = tpu.matmul %1, %2, %cst {dimension_numbers = #tpu.dot_dimension_numbers<[1], [0], [0], [1], [0, 0, 1, 1], [], []>} : vector<16x32xbf16>, vector<32x96xbf16>, vector<16x96xf32> -> vector<16x96xf32>
    %c0_3 = arith.constant 0 : index
    %c0_4 = arith.constant 0 : index
    %4 = vector.load %arg4[%c0_3, %c0_4] : memref<1x96xf32, #tpu.memory_space<vmem>>, vector<1x96xf32>
    %5 = vector.broadcast %4 : vector<1x96xf32> to vector<16x96xf32>
    %6 = arith.addf %3, %5 : vector<16x96xf32>
    %7 = vector.extract_strided_slice %6 {offsets = [0, 0], sizes = [16, 8], strides = [1, 1]} : vector<16x96xf32> to vector<16x8xf32>
    %8 = vector.extract_strided_slice %6 {offsets = [0, 8], sizes = [16, 8], strides = [1, 1]} : vector<16x96xf32> to vector<16x8xf32>
    %9 = vector.extract_strided_slice %6 {offsets = [0, 16], sizes = [16, 8], strides = [1, 1]} : vector<16x96xf32> to vector<16x8xf32>
    %10 = vector.extract_strided_slice %6 {offsets = [0, 24], sizes = [16, 8], strides = [1, 1]} : vector<16x96xf32> to vector<16x8xf32>
    %11 = vector.extract_strided_slice %6 {offsets = [0, 32], sizes = [16, 8], strides = [1, 1]} : vector<16x96xf32> to vector<16x8xf32>
    %12 = vector.extract_strided_slice %6 {offsets = [0, 40], sizes = [16, 8], strides = [1, 1]} : vector<16x96xf32> to vector<16x8xf32>
    %13 = vector.extract_strided_slice %6 {offsets = [0, 48], sizes = [16, 8], strides = [1, 1]} : vector<16x96xf32> to vector<16x8xf32>
    %14 = vector.extract_strided_slice %6 {offsets = [0, 56], sizes = [16, 8], strides = [1, 1]} : vector<16x96xf32> to vector<16x8xf32>
    %15 = vector.extract_strided_slice %6 {offsets = [0, 64], sizes = [16, 8], strides = [1, 1]} : vector<16x96xf32> to vector<16x8xf32>
    %16 = vector.extract_strided_slice %6 {offsets = [0, 72], sizes = [16, 8], strides = [1, 1]} : vector<16x96xf32> to vector<16x8xf32>
    %17 = vector.extract_strided_slice %6 {offsets = [0, 80], sizes = [16, 8], strides = [1, 1]} : vector<16x96xf32> to vector<16x8xf32>
    %18 = vector.extract_strided_slice %6 {offsets = [0, 88], sizes = [16, 8], strides = [1, 1]} : vector<16x96xf32> to vector<16x8xf32>
    %19 = vector.shape_cast %7 : vector<16x8xf32> to vector<1x16x8xf32>
    %20 = vector.shape_cast %8 : vector<16x8xf32> to vector<1x16x8xf32>
    %21 = vector.shape_cast %9 : vector<16x8xf32> to vector<1x16x8xf32>
    %22 = vector.shape_cast %10 : vector<16x8xf32> to vector<1x16x8xf32>
    %23 = vector.shape_cast %11 : vector<16x8xf32> to vector<1x16x8xf32>
    %24 = vector.shape_cast %12 : vector<16x8xf32> to vector<1x16x8xf32>
    %25 = vector.shape_cast %13 : vector<16x8xf32> to vector<1x16x8xf32>
    %26 = vector.shape_cast %14 : vector<16x8xf32> to vector<1x16x8xf32>
    %27 = vector.shape_cast %15 : vector<16x8xf32> to vector<1x16x8xf32>
    %28 = vector.shape_cast %16 : vector<16x8xf32> to vector<1x16x8xf32>
    %29 = vector.shape_cast %17 : vector<16x8xf32> to vector<1x16x8xf32>
    %30 = vector.shape_cast %18 : vector<16x8xf32> to vector<1x16x8xf32>
    %31 = tpu.concatenate %19, %20, %21, %22, %23, %24, %25, %26, %27, %28, %29, %30 in 0 : vector<1x16x8xf32>, vector<1x16x8xf32>, vector<1x16x8xf32>, vector<1x16x8xf32>, vector<1x16x8xf32>, vector<1x16x8xf32>, vector<1x16x8xf32>, vector<1x16x8xf32>, vector<1x16x8xf32>, vector<1x16x8xf32>, vector<1x16x8xf32>, vector<1x16x8xf32> -> vector<12x16x8xf32>
    %32 = vector.extract_strided_slice %31 {offsets = [0, 0, 0], sizes = [4, 16, 8], strides = [1, 1, 1]} : vector<12x16x8xf32> to vector<4x16x8xf32>
    %33 = vector.shape_cast %32 : vector<4x16x8xf32> to vector<8x8x8xf32>
    %34 = arith.truncf %33 : vector<8x8x8xf32> to vector<8x8x8xbf16>
    %35 = vector.extract_strided_slice %31 {offsets = [4, 0, 0], sizes = [4, 16, 8], strides = [1, 1, 1]} : vector<12x16x8xf32> to vector<4x16x8xf32>
    %36 = vector.shape_cast %35 : vector<4x16x8xf32> to vector<8x8x8xf32>
    %37 = arith.truncf %36 : vector<8x8x8xf32> to vector<8x8x8xbf16>
    %38 = vector.extract_strided_slice %31 {offsets = [8, 0, 0], sizes = [4, 16, 8], strides = [1, 1, 1]} : vector<12x16x8xf32> to vector<4x16x8xf32>
    %39 = vector.shape_cast %38 : vector<4x16x8xf32> to vector<8x8x8xf32>
    %40 = arith.truncf %39 : vector<8x8x8xf32> to vector<8x8x8xbf16>
    "tpu.trace_start"() <{level = 10 : i32, message = "gqd,gkd->gqk"}> : () -> ()
    %cst_5 = arith.constant dense<0.000000e+00> : vector<8x8x8xf32>
    %41 = tpu.matmul %34, %37, %cst_5 {dimension_numbers = #tpu.dot_dimension_numbers<[2], [2], [1], [1], [0, 0, 0, 1, 1, 1], [0], [0]>} : vector<8x8x8xbf16>, vector<8x8x8xbf16>, vector<8x8x8xf32> -> vector<8x8x8xf32>
    "tpu.trace_stop"() : () -> ()
    %c0_6 = arith.constant 0 : index
    %c0_7 = arith.constant 0 : index
    %c0_8 = arith.constant 0 : index
    %42 = vector.load %arg2[%c0_6, %c0_7, %c0_8] : memref<2x1x8xf32, #tpu.memory_space<vmem>>, vector<2x1x8xf32>
    %43 = vector.shape_cast %42 : vector<2x1x8xf32> to vector<1x2x1x8xf32>
    %44 = vector.shape_cast %43 : vector<1x2x1x8xf32> to vector<1x2x1x8xf32>
    %45 = vector.broadcast %44 : vector<1x2x1x8xf32> to vector<4x2x1x8xf32>
    %46 = vector.shape_cast %45 : vector<4x2x1x8xf32> to vector<8x1x8xf32>
    %47 = vector.broadcast %46 : vector<8x1x8xf32> to vector<8x8x8xf32>
    %48 = arith.addf %41, %47 : vector<8x8x8xf32>
    %cst_9 = arith.constant dense<0xFF800000> : vector<8x8xf32>
    %49 = vector.multi_reduction <maximumf>, %48, %cst_9 [2] : vector<8x8x8xf32> to vector<8x8xf32>
    %50 = vector.shape_cast %49 : vector<8x8xf32> to vector<8x8x1xf32>
    %51 = vector.broadcast %50 : vector<8x8x1xf32> to vector<8x8x8xf32>
    %52 = arith.subf %48, %51 : vector<8x8x8xf32>
    %53 = math.exp %52 : vector<8x8x8xf32>
    %cst_10 = arith.constant dense<0.000000e+00> : vector<8x8xf32>
    %54 = vector.multi_reduction <add>, %53, %cst_10 [2] : vector<8x8x8xf32> to vector<8x8xf32>
    %55 = vector.shape_cast %54 : vector<8x8xf32> to vector<8x8x1xf32>
    %56 = tpu.reciprocal %55 {approx = true} : vector<8x8x1xf32> -> vector<8x8x1xf32>
    %57 = vector.broadcast %56 : vector<8x8x1xf32> to vector<8x8x8xf32>
    %58 = arith.mulf %53, %57 : vector<8x8x8xf32>
    %59 = arith.truncf %58 : vector<8x8x8xf32> to vector<8x8x8xbf16>
    "tpu.trace_start"() <{level = 10 : i32, message = "gqk,gkd->gqd"}> : () -> ()
    %cst_11 = arith.constant dense<0.000000e+00> : vector<8x8x8xf32>
    %60 = tpu.matmul %59, %40, %cst_11 {dimension_numbers = #tpu.dot_dimension_numbers<[2], [1], [1], [2], [0, 0, 0, 1, 1, 2], [0], [0]>} : vector<8x8x8xbf16>, vector<8x8x8xbf16>, vector<8x8x8xf32> -> vector<8x8x8xf32>
    "tpu.trace_stop"() : () -> ()
    %61 = vector.shape_cast %60 : vector<8x8x8xf32> to vector<4x16x8xf32>
    %62 = arith.truncf %61 : vector<4x16x8xf32> to vector<4x16x8xbf16>
    %c0_12 = arith.constant 0 : index
    %c0_13 = arith.constant 0 : index
    %c0_14 = arith.constant 0 : index
    %63 = vector.load %arg5[%c0_12, %c0_13, %c0_14] : memref<4x8x32xbf16, #tpu.memory_space<vmem>>, vector<4x8x32xbf16>
    "tpu.trace_start"() <{level = 10 : i32, message = "hmd,hdn->hmn"}> : () -> ()
    %cst_15 = arith.constant dense<0.000000e+00> : vector<4x16x32xf32>
    %64 = tpu.matmul %62, %63, %cst_15 {dimension_numbers = #tpu.dot_dimension_numbers<[2], [1], [1], [2], [0, 0, 0, 1, 1, 2], [0], [0]>} : vector<4x16x8xbf16>, vector<4x8x32xbf16>, vector<4x16x32xf32> -> vector<4x16x32xf32>
    "tpu.trace_stop"() : () -> ()
    %cst_16 = arith.constant dense<0.000000e+00> : vector<16x32xf32>
    %65 = vector.multi_reduction <add>, %64, %cst_16 [0] : vector<4x16x32xf32> to vector<16x32xf32>
    %c0_17 = arith.constant 0 : index
    %c0_18 = arith.constant 0 : index
    %66 = vector.load %arg6[%c0_17, %c0_18] : memref<1x32xf32, #tpu.memory_space<vmem>>, vector<1x32xf32>
    %67 = vector.broadcast %66 : vector<1x32xf32> to vector<16x32xf32>
    %68 = arith.addf %65, %67 : vector<16x32xf32>
    %69 = arith.addf %0, %68 : vector<16x32xf32>
    %c0_19 = arith.constant 0 : index
    %c0_20 = arith.constant 0 : index
    %70 = vector.load %arg11[%c0_19, %c0_20] : memref<1x32xf32, #tpu.memory_space<vmem>>, vector<1x32xf32>
    %c0_21 = arith.constant 0 : index
    %c0_22 = arith.constant 0 : index
    %71 = vector.load %arg12[%c0_21, %c0_22] : memref<1x32xf32, #tpu.memory_space<vmem>>, vector<1x32xf32>
    %cst_23 = arith.constant dense<0.000000e+00> : vector<16xf32>
    %72 = vector.multi_reduction <add>, %69, %cst_23 [1] : vector<16x32xf32> to vector<16xf32>
    %73 = vector.shape_cast %72 : vector<16xf32> to vector<16x1xf32>
    %cst_24 = arith.constant 3.200000e+01 : f32
    %74 = vector.broadcast %cst_24 : f32 to vector<16x1xf32>
    %75 = arith.divf %73, %74 : vector<16x1xf32>
    %76 = vector.broadcast %75 : vector<16x1xf32> to vector<16x32xf32>
    %77 = arith.subf %69, %76 : vector<16x32xf32>
    %78 = arith.mulf %77, %77 : vector<16x32xf32>
    %cst_25 = arith.constant dense<0.000000e+00> : vector<16xf32>
    %79 = vector.multi_reduction <add>, %78, %cst_25 [1] : vector<16x32xf32> to vector<16xf32>
    %80 = vector.shape_cast %79 : vector<16xf32> to vector<16x1xf32>
    %cst_26 = arith.constant 3.200000e+01 : f32
    %81 = vector.broadcast %cst_26 : f32 to vector<16x1xf32>
    %82 = arith.divf %80, %81 : vector<16x1xf32>
    %83 = vector.broadcast %75 : vector<16x1xf32> to vector<16x32xf32>
    %84 = arith.subf %69, %83 : vector<16x32xf32>
    %cst_27 = arith.constant 9.99999974E-6 : f32
    %85 = vector.broadcast %cst_27 : f32 to vector<16x1xf32>
    %86 = arith.addf %82, %85 : vector<16x1xf32>
    %87 = math.rsqrt %86 : vector<16x1xf32>
    %88 = vector.broadcast %87 : vector<16x1xf32> to vector<16x32xf32>
    %89 = arith.mulf %84, %88 : vector<16x32xf32>
    %90 = vector.broadcast %70 : vector<1x32xf32> to vector<16x32xf32>
    %91 = arith.mulf %89, %90 : vector<16x32xf32>
    %92 = vector.broadcast %71 : vector<1x32xf32> to vector<16x32xf32>
    %93 = arith.addf %91, %92 : vector<16x32xf32>
    %94 = arith.truncf %93 : vector<16x32xf32> to vector<16x32xbf16>
    %c0_28 = arith.constant 0 : index
    %c0_29 = arith.constant 0 : index
    %95 = vector.load %arg7[%c0_28, %c0_29] : memref<32x64xbf16, #tpu.memory_space<vmem>>, vector<32x64xbf16>
    %cst_30 = arith.constant dense<0.000000e+00> : vector<16x64xf32>
    %96 = tpu.matmul %94, %95, %cst_30 {dimension_numbers = #tpu.dot_dimension_numbers<[1], [0], [0], [1], [0, 0, 1, 1], [], []>} : vector<16x32xbf16>, vector<32x64xbf16>, vector<16x64xf32> -> vector<16x64xf32>
    %c0_31 = arith.constant 0 : index
    %c0_32 = arith.constant 0 : index
    %97 = vector.load %arg8[%c0_31, %c0_32] : memref<1x64xf32, #tpu.memory_space<vmem>>, vector<1x64xf32>
    %98 = vector.broadcast %97 : vector<1x64xf32> to vector<16x64xf32>
    %99 = arith.addf %96, %98 : vector<16x64xf32>
    %cst_33 = arith.constant 0.000000e+00 : f32
    %100 = vector.broadcast %cst_33 : f32 to vector<16x64xf32>
    %101 = arith.maximumf %99, %100 : vector<16x64xf32>
    %102 = arith.truncf %101 : vector<16x64xf32> to vector<16x64xbf16>
    %c0_34 = arith.constant 0 : index
    %c0_35 = arith.constant 0 : index
    %103 = vector.load %arg9[%c0_34, %c0_35] : memref<64x32xbf16, #tpu.memory_space<vmem>>, vector<64x32xbf16>
    %cst_36 = arith.constant dense<0.000000e+00> : vector<16x32xf32>
    %104 = tpu.matmul %102, %103, %cst_36 {dimension_numbers = #tpu.dot_dimension_numbers<[1], [0], [0], [1], [0, 0, 1, 1], [], []>} : vector<16x64xbf16>, vector<64x32xbf16>, vector<16x32xf32> -> vector<16x32xf32>
    %c0_37 = arith.constant 0 : index
    %c0_38 = arith.constant 0 : index
    %105 = vector.load %arg10[%c0_37, %c0_38] : memref<1x32xf32, #tpu.memory_space<vmem>>, vector<1x32xf32>
    %106 = vector.broadcast %105 : vector<1x32xf32> to vector<16x32xf32>
    %107 = arith.addf %104, %106 : vector<16x32xf32>
    %108 = arith.addf %93, %107 : vector<16x32xf32>
    %c0_39 = arith.constant 0 : index
    %c0_40 = arith.constant 0 : index
    %109 = vector.load %arg13[%c0_39, %c0_40] : memref<1x32xf32, #tpu.memory_space<vmem>>, vector<1x32xf32>
    %c0_41 = arith.constant 0 : index
    %c0_42 = arith.constant 0 : index
    %110 = vector.load %arg14[%c0_41, %c0_42] : memref<1x32xf32, #tpu.memory_space<vmem>>, vector<1x32xf32>
    %cst_43 = arith.constant dense<0.000000e+00> : vector<16xf32>
    %111 = vector.multi_reduction <add>, %108, %cst_43 [1] : vector<16x32xf32> to vector<16xf32>
    %112 = vector.shape_cast %111 : vector<16xf32> to vector<16x1xf32>
    %cst_44 = arith.constant 3.200000e+01 : f32
    %113 = vector.broadcast %cst_44 : f32 to vector<16x1xf32>
    %114 = arith.divf %112, %113 : vector<16x1xf32>
    %115 = vector.broadcast %114 : vector<16x1xf32> to vector<16x32xf32>
    %116 = arith.subf %108, %115 : vector<16x32xf32>
    %117 = arith.mulf %116, %116 : vector<16x32xf32>
    %cst_45 = arith.constant dense<0.000000e+00> : vector<16xf32>
    %118 = vector.multi_reduction <add>, %117, %cst_45 [1] : vector<16x32xf32> to vector<16xf32>
    %119 = vector.shape_cast %118 : vector<16xf32> to vector<16x1xf32>
    %cst_46 = arith.constant 3.200000e+01 : f32
    %120 = vector.broadcast %cst_46 : f32 to vector<16x1xf32>
    %121 = arith.divf %119, %120 : vector<16x1xf32>
    %122 = vector.broadcast %114 : vector<16x1xf32> to vector<16x32xf32>
    %123 = arith.subf %108, %122 : vector<16x32xf32>
    %cst_47 = arith.constant 9.99999974E-6 : f32
    %124 = vector.broadcast %cst_47 : f32 to vector<16x1xf32>
    %125 = arith.addf %121, %124 : vector<16x1xf32>
    %126 = math.rsqrt %125 : vector<16x1xf32>
    %127 = vector.broadcast %126 : vector<16x1xf32> to vector<16x32xf32>
    %128 = arith.mulf %123, %127 : vector<16x32xf32>
    %129 = vector.broadcast %109 : vector<1x32xf32> to vector<16x32xf32>
    %130 = arith.mulf %128, %129 : vector<16x32xf32>
    %131 = vector.broadcast %110 : vector<1x32xf32> to vector<16x32xf32>
    %132 = arith.addf %130, %131 : vector<16x32xf32>
    %c0_48 = arith.constant 0 : index
    %c0_49 = arith.constant 0 : index
    %133 = vector.load %arg15[%c0_48, %c0_49] : memref<16x32xf32, #tpu.memory_space<vmem>>, vector<16x32xf32>
    tpu.vector_store %arg15[%c0_48, %c0_49], %132 {strides = array<i32>} : memref<16x32xf32, #tpu.memory_space<vmem>>, vector<16x32xf32>,
    return
  }
  func.func @transform_0(%arg0: i32) -> (i32, i32) {
    %c0_i32 = arith.constant 0 : i32
    %c0_i32_0 = arith.constant 0 : i32
    return %arg0, %c0_i32 : i32, i32
  }
  func.func @transform_1(%arg0: i32) -> (i32, i32, i32) {
    %c0_i32 = arith.constant 0 : i32
    %c0_i32_0 = arith.constant 0 : i32
    %c0_i32_1 = arith.constant 0 : i32
    return %arg0, %c0_i32, %c0_i32_0 : i32, i32, i32
  }
  func.func @transform_2(%arg0: i32) -> (i32, i32) {
    %c0_i32 = arith.constant 0 : i32
    %c0_i32_0 = arith.constant 0 : i32
    %c0_i32_1 = arith.constant 0 : i32
    return %c0_i32, %c0_i32_0 : i32, i32
  }
  func.func @transform_3(%arg0: i32) -> (i32, i32) {
    %c0_i32 = arith.constant 0 : i32
    %c0_i32_0 = arith.constant 0 : i32
    %c0_i32_1 = arith.constant 0 : i32
    return %c0_i32, %c0_i32_0 : i32, i32
  }
  func.func @transform_4(%arg0: i32) -> (i32, i32, i32) {
    %c0_i32 = arith.constant 0 : i32
    %c0_i32_0 = arith.constant 0 : i32
    %c0_i32_1 = arith.constant 0 : i32
    %c0_i32_2 = arith.constant 0 : i32
    return %c0_i32, %c0_i32_0, %c0_i32_1 : i32, i32, i32
  }
  func.func @transform_5(%arg0: i32) -> (i32, i32) {
    %c0_i32 = arith.constant 0 : i32
    %c0_i32_0 = arith.constant 0 : i32
    %c0_i32_1 = arith.constant 0 : i32
    return %c0_i32, %c0_i32_0 : i32, i32
  }
  func.func @transform_6(%arg0: i32) -> (i32, i32) {
    %c0_i32 = arith.constant 0 : i32
    %c0_i32_0 = arith.constant 0 : i32
    %c0_i32_1 = arith.constant 0 : i32
    return %c0_i32, %c0_i32_0 : i32, i32
  }
  func.func @transform_7(%arg0: i32) -> (i32, i32) {
    %c0_i32 = arith.constant 0 : i32
    %c0_i32_0 = arith.constant 0 : i32
    %c0_i32_1 = arith.constant 0 : i32
    return %c0_i32, %c0_i32_0 : i32, i32
  }
  func.func @transform_8(%arg0: i32) -> (i32, i32) {
    %c0_i32 = arith.constant 0 : i32
    %c0_i32_0 = arith.constant 0 : i32
    %c0_i32_1 = arith.constant 0 : i32
    return %c0_i32, %c0_i32_0 : i32, i32
  }
  func.func @transform_9(%arg0: i32) -> (i32, i32) {
    %c0_i32 = arith.constant 0 : i32
    %c0_i32_0 = arith.constant 0 : i32
    %c0_i32_1 = arith.constant 0 : i32
    return %c0_i32, %c0_i32_0 : i32, i32
  }
  func.func @transform_10(%arg0: i32) -> (i32, i32) {
    %c0_i32 = arith.constant 0 : i32
    %c0_i32_0 = arith.constant 0 : i32
    %c0_i32_1 = arith.constant 0 : i32
    return %c0_i32, %c0_i32_0 : i32, i32
  }
  func.func @transform_11(%arg0: i32) -> (i32, i32) {
    %c0_i32 = arith.constant 0 : i32
    %c0_i32_0 = arith.constant 0 : i32
    %c0_i32_1 = arith.constant 0 : i32
    return %c0_i32, %c0_i32_0 : i32, i32
  }
  func.func @transform_12(%arg0: i32) -> (i32, i32) {
    %c0_i32 = arith.constant 0 : i32
    %c0_i32_0 = arith.constant 0 : i32
    %c0_i32_1 = arith.constant 0 : i32
    return %c0_i32, %c0_i32_0 : i32, i32
  }
  func.func @transform_13(%arg0: i32) -> (i32, i32) {
    %c0_i32 = arith.constant 0 : i32
    %c0_i32_0 = arith.constant 0 : i32
    %c0_i32_1 = arith.constant 0 : i32
    return %c0_i32, %c0_i32_0 : i32, i32
  }
  func.func @transform_14(%arg0: i32) -> (i32, i32) {
    %c0_i32 = arith.constant 0 : i32
    %c0_i32_0 = arith.constant 0 : i32
    return %arg0, %c0_i32 : i32, i32
  }
}

module attributes {stable_mosaic.version = 11 : i64} {
  func.func @encoder_layer_kernel(%arg0: i32, %arg1: memref<16x32xf32, #tpu.memory_space<vmem>>, %arg2: memref<2x1x8xf32, #tpu.memory_space<vmem>>, %arg3: memref<32x96xbf16, #tpu.memory_space<vmem>>, %arg4: memref<1x96xf32, #tpu.memory_space<vmem>>, %arg5: memref<4x8x32xbf16, #tpu.memory_space<vmem>>, %arg6: memref<1x32xf32, #tpu.memory_space<vmem>>, %arg7: memref<32x64xbf16, #tpu.memory_space<vmem>>, %arg8: memref<1x64xf32, #tpu.memory_space<vmem>>, %arg9: memref<64x32xbf16, #tpu.memory_space<vmem>>, %arg10: memref<1x32xf32, #tpu.memory_space<vmem>>, %arg11: memref<1x32xf32, #tpu.memory_space<vmem>>, %arg12: memref<1x32xf32, #tpu.memory_space<vmem>>, %arg13: memref<1x32xf32, #tpu.memory_space<vmem>>, %arg14: memref<1x32xf32, #tpu.memory_space<vmem>>, %arg15: memref<16x32xf32, #tpu.memory_space<vmem>>) attributes {dimension_semantics = [#tpu.dimension_semantics<parallel>], iteration_bounds = array<i64: 1>, scalar_prefetch = 0 : i64, scratch_operands = 0 : i64, tpu.core_type = #tpu.core_type<tc>, window_params = [{transform_indices = @transform_0, window_bounds = array<i64: 16, 32>}, {transform_indices = @transform_1, window_bounds = array<i64: 2, 1, 8>}, {pipeline_mode = #tpu.pipeline_mode<synchronous>, transform_indices = @transform_2, window_bounds = array<i64: 32, 96>}, {pipeline_mode = #tpu.pipeline_mode<synchronous>, transform_indices = @transform_3, window_bounds = array<i64: 1, 96>}, {pipeline_mode = #tpu.pipeline_mode<synchronous>, transform_indices = @transform_4, window_bounds = array<i64: 4, 8, 32>}, {pipeline_mode = #tpu.pipeline_mode<synchronous>, transform_indices = @transform_5, window_bounds = array<i64: 1, 32>}, {pipeline_mode = #tpu.pipeline_mode<synchronous>, transform_indices = @transform_6, window_bounds = array<i64: 32, 64>}, {pipeline_mode = #tpu.pipeline_mode<synchronous>, transform_indices = @transform_7, window_bounds = array<i64: 1, 64>}, {pipeline_mode = #tpu.pipeline_mode<synchronous>, transform_indices = @transform_8, window_bounds = array<i64: 64, 32>}, {pipeline_mode = #tpu.pipeline_mode<synchronous>, transform_indices = @transform_9, window_bounds = array<i64: 1, 32>}, {pipeline_mode = #tpu.pipeline_mode<synchronous>, transform_indices = @transform_10, window_bounds = array<i64: 1, 32>}, {pipeline_mode = #tpu.pipeline_mode<synchronous>, transform_indices = @transform_11, window_bounds = array<i64: 1, 32>}, {pipeline_mode = #tpu.pipeline_mode<synchronous>, transform_indices = @transform_12, window_bounds = array<i64: 1, 32>}, {pipeline_mode = #tpu.pipeline_mode<synchronous>, transform_indices = @transform_13, window_bounds = array<i64: 1, 32>}, {transform_indices = @transform_14, window_bounds = array<i64: 16, 32>}]} {
    %c0 = arith.constant 0 : index
    %c0_0 = arith.constant 0 : index
    %0 = vector.load %arg1[%c0, %c0_0] : memref<16x32xf32, #tpu.memory_space<vmem>>, vector<16x32xf32>
    %1 = arith.truncf %0 : vector<16x32xf32> to vector<16x32xbf16>
    %c0_1 = arith.constant 0 : index
    %c0_2 = arith.constant 0 : index
    %2 = vector.load %arg3[%c0_1, %c0_2] : memref<32x96xbf16, #tpu.memory_space<vmem>>, vector<32x96xbf16>
    %cst = arith.constant dense<0.000000e+00> : vector<16x96xf32>
    %3 = tpu.matmul %1, %2, %cst {dimension_numbers = #tpu.dot_dimension_numbers<[1], [0], [0], [1], [0, 0, 1, 1], [], []>} : vector<16x32xbf16>, vector<32x96xbf16>, vector<16x96xf32> -> vector<16x96xf32>
    %c0_3 = arith.constant 0 : index
    %c0_4 = arith.constant 0 : index
    %4 = vector.load %arg4[%c0_3, %c0_4] : memref<1x96xf32, #tpu.memory_space<vmem>>, vector<1x96xf32>
    %5 = vector.broadcast %4 : vector<1x96xf32> to vector<16x96xf32>
    %6 = arith.addf %3, %5 : vector<16x96xf32>
    %7 = vector.extract_strided_slice %6 {offsets = [0, 0], sizes = [16, 8], strides = [1, 1]} : vector<16x96xf32> to vector<16x8xf32>
    %8 = vector.extract_strided_slice %6 {offsets = [0, 8], sizes = [16, 8], strides = [1, 1]} : vector<16x96xf32> to vector<16x8xf32>
    %9 = vector.extract_strided_slice %6 {offsets = [0, 16], sizes = [16, 8], strides = [1, 1]} : vector<16x96xf32> to vector<16x8xf32>
    %10 = vector.extract_strided_slice %6 {offsets = [0, 24], sizes = [16, 8], strides = [1, 1]} : vector<16x96xf32> to vector<16x8xf32>
    %11 = vector.extract_strided_slice %6 {offsets = [0, 32], sizes = [16, 8], strides = [1, 1]} : vector<16x96xf32> to vector<16x8xf32>
    %12 = vector.extract_strided_slice %6 {offsets = [0, 40], sizes = [16, 8], strides = [1, 1]} : vector<16x96xf32> to vector<16x8xf32>
    %13 = vector.extract_strided_slice %6 {offsets = [0, 48], sizes = [16, 8], strides = [1, 1]} : vector<16x96xf32> to vector<16x8xf32>
    %14 = vector.extract_strided_slice %6 {offsets = [0, 56], sizes = [16, 8], strides = [1, 1]} : vector<16x96xf32> to vector<16x8xf32>
    %15 = vector.extract_strided_slice %6 {offsets = [0, 64], sizes = [16, 8], strides = [1, 1]} : vector<16x96xf32> to vector<16x8xf32>
    %16 = vector.extract_strided_slice %6 {offsets = [0, 72], sizes = [16, 8], strides = [1, 1]} : vector<16x96xf32> to vector<16x8xf32>
    %17 = vector.extract_strided_slice %6 {offsets = [0, 80], sizes = [16, 8], strides = [1, 1]} : vector<16x96xf32> to vector<16x8xf32>
    %18 = vector.extract_strided_slice %6 {offsets = [0, 88], sizes = [16, 8], strides = [1, 1]} : vector<16x96xf32> to vector<16x8xf32>
    %19 = vector.shape_cast %7 : vector<16x8xf32> to vector<1x16x8xf32>
    %20 = vector.shape_cast %8 : vector<16x8xf32> to vector<1x16x8xf32>
    %21 = vector.shape_cast %9 : vector<16x8xf32> to vector<1x16x8xf32>
    %22 = vector.shape_cast %10 : vector<16x8xf32> to vector<1x16x8xf32>
    %23 = vector.shape_cast %11 : vector<16x8xf32> to vector<1x16x8xf32>
    %24 = vector.shape_cast %12 : vector<16x8xf32> to vector<1x16x8xf32>
    %25 = vector.shape_cast %13 : vector<16x8xf32> to vector<1x16x8xf32>
    %26 = vector.shape_cast %14 : vector<16x8xf32> to vector<1x16x8xf32>
    %27 = vector.shape_cast %15 : vector<16x8xf32> to vector<1x16x8xf32>
    %28 = vector.shape_cast %16 : vector<16x8xf32> to vector<1x16x8xf32>
    %29 = vector.shape_cast %17 : vector<16x8xf32> to vector<1x16x8xf32>
    %30 = vector.shape_cast %18 : vector<16x8xf32> to vector<1x16x8xf32>
    %31 = tpu.concatenate %19, %20, %21, %22, %23, %24, %25, %26, %27, %28, %29, %30 in 0 : vector<1x16x8xf32>, vector<1x16x8xf32>, vector<1x16x8xf32>, vector<1x16x8xf32>, vector<1x16x8xf32>, vector<1x16x8xf32>, vector<1x16x8xf32>, vector<1x16x8xf32>, vector<1x16x8xf32>, vector<1x16x8xf32>, vector<1x16x8xf32>, vector<1x16x8xf32> -> vector<12x16x8xf32>
    %32 = vector.extract_strided_slice %31 {offsets = [0, 0, 0], sizes = [4, 16, 8], strides = [1, 1, 1]} : vector<12x16x8xf32> to vector<4x16x8xf32>
    %33 = vector.shape_cast %32 : vector<4x16x8xf32> to vector<8x8x8xf32>
    %34 = arith.truncf %33 : vector<8x8x8xf32> to vector<8x8x8xbf16>
    %35 = vector.extract_strided_slice %31 {offsets = [4, 0, 0], sizes = [4, 16, 8], strides = [1, 1, 1]} : vector<12x16x8xf32> to vector<4x16x8xf32>
    %36 = vector.shape_cast %35 : vector<4x16x8xf32> to vector<8x8x8xf32>
    %37 = arith.truncf %36 : vector<8x8x8xf32> to vector<8x8x8xbf16>
    %38 = vector.extract_strided_slice %31 {offsets = [8, 0, 0], sizes = [4, 16, 8], strides = [1, 1, 1]} : vector<12x16x8xf32> to vector<4x16x8xf32>
    %39 = vector.shape_cast %38 : vector<4x16x8xf32> to vector<8x8x8xf32>
    %40 = arith.truncf %39 : vector<8x8x8xf32> to vector<8x8x8xbf16>
    "tpu.trace_start"() <{level = 10 : i32, message = "gqd,gkd->gqk"}> : () -> ()
    %cst_5 = arith.constant dense<0.000000e+00> : vector<8x8x8xf32>
    %41 = tpu.matmul %34, %37, %cst_5 {dimension_numbers = #tpu.dot_dimension_numbers<[2], [2], [1], [1], [0, 0, 0, 1, 1, 1], [0], [0]>} : vector<8x8x8xbf16>, vector<8x8x8xbf16>, vector<8x8x8xf32> -> vector<8x8x8xf32>
    "tpu.trace_stop"() : () -> ()
    %c0_6 = arith.constant 0 : index
    %c0_7 = arith.constant 0 : index
    %c0_8 = arith.constant 0 : index
    %42 = vector.load %arg2[%c0_6, %c0_7, %c0_8] : memref<2x1x8xf32, #tpu.memory_space<vmem>>, vector<2x1x8xf32>
    %43 = vector.shape_cast %42 : vector<2x1x8xf32> to vector<1x2x1x8xf32>
    %44 = vector.shape_cast %43 : vector<1x2x1x8xf32> to vector<1x2x1x8xf32>
    %45 = vector.broadcast %44 : vector<1x2x1x8xf32> to vector<4x2x1x8xf32>
    %46 = vector.shape_cast %45 : vector<4x2x1x8xf32> to vector<8x1x8xf32>
    %47 = vector.broadcast %46 : vector<8x1x8xf32> to vector<8x8x8xf32>
    %48 = arith.addf %41, %47 : vector<8x8x8xf32>
    %cst_9 = arith.constant dense<0xFF800000> : vector<8x8xf32>
    %49 = vector.multi_reduction <maximumf>, %48, %cst_9 [2] : vector<8x8x8xf32> to vector<8x8xf32>
    %50 = vector.shape_cast %49 : vector<8x8xf32> to vector<8x8x1xf32>
    %51 = vector.broadcast %50 : vector<8x8x1xf32> to vector<8x8x8xf32>
    %52 = arith.subf %48, %51 : vector<8x8x8xf32>
    %53 = math.exp %52 : vector<8x8x8xf32>
    %cst_10 = arith.constant dense<0.000000e+00> : vector<8x8xf32>
    %54 = vector.multi_reduction <add>, %53, %cst_10 [2] : vector<8x8x8xf32> to vector<8x8xf32>
    %55 = vector.shape_cast %54 : vector<8x8xf32> to vector<8x8x1xf32>
    %56 = tpu.reciprocal %55 {approx = true} : vector<8x8x1xf32> -> vector<8x8x1xf32>
    %57 = vector.broadcast %56 : vector<8x8x1xf32> to vector<8x8x8xf32>
    %58 = arith.mulf %53, %57 : vector<8x8x8xf32>
    %59 = arith.truncf %58 : vector<8x8x8xf32> to vector<8x8x8xbf16>
    "tpu.trace_start"() <{level = 10 : i32, message = "gqk,gkd->gqd"}> : () -> ()
    %cst_11 = arith.constant dense<0.000000e+00> : vector<8x8x8xf32>
    %60 = tpu.matmul %59, %40, %cst_11 {dimension_numbers = #tpu.dot_dimension_numbers<[2], [1], [1], [2], [0, 0, 0, 1, 1, 2], [0], [0]>} : vector<8x8x8xbf16>, vector<8x8x8xbf16>, vector<8x8x8xf32> -> vector<8x8x8xf32>
    "tpu.trace_stop"() : () -> ()
    %61 = vector.shape_cast %60 : vector<8x8x8xf32> to vector<4x16x8xf32>
    %62 = arith.truncf %61 : vector<4x16x8xf32> to vector<4x16x8xbf16>
    %c0_12 = arith.constant 0 : index
    %c0_13 = arith.constant 0 : index
    %c0_14 = arith.constant 0 : index
    %63 = vector.load %arg5[%c0_12, %c0_13, %c0_14] : memref<4x8x32xbf16, #tpu.memory_space<vmem>>, vector<4x8x32xbf16>
    "tpu.trace_start"() <{level = 10 : i32, message = "hmd,hdn->hmn"}> : () -> ()
    %cst_15 = arith.constant dense<0.000000e+00> : vector<4x16x32xf32>
    %64 = tpu.matmul %62, %63, %cst_15 {dimension_numbers = #tpu.dot_dimension_numbers<[2], [1], [1], [2], [0, 0, 0, 1, 1, 2], [0], [0]>} : vector<4x16x8xbf16>, vector<4x8x32xbf16>, vector<4x16x32xf32> -> vector<4x16x32xf32>
    "tpu.trace_stop"() : () -> ()
    %cst_16 = arith.constant dense<0.000000e+00> : vector<16x32xf32>
    %65 = vector.multi_reduction <add>, %64, %cst_16 [0] : vector<4x16x32xf32> to vector<16x32xf32>
    %c0_17 = arith.constant 0 : index
    %c0_18 = arith.constant 0 : index
    %66 = vector.load %arg6[%c0_17, %c0_18] : memref<1x32xf32, #tpu.memory_space<vmem>>, vector<1x32xf32>
    %67 = vector.broadcast %66 : vector<1x32xf32> to vector<16x32xf32>
    %68 = arith.addf %65, %67 : vector<16x32xf32>
    %69 = arith.addf %0, %68 : vector<16x32xf32>
    %c0_19 = arith.constant 0 : index
    %c0_20 = arith.constant 0 : index
    %70 = vector.load %arg11[%c0_19, %c0_20] : memref<1x32xf32, #tpu.memory_space<vmem>>, vector<1x32xf32>
    %c0_21 = arith.constant 0 : index
    %c0_22 = arith.constant 0 : index
    %71 = vector.load %arg12[%c0_21, %c0_22] : memref<1x32xf32, #tpu.memory_space<vmem>>, vector<1x32xf32>
    %cst_23 = arith.constant dense<0.000000e+00> : vector<16xf32>
    %72 = vector.multi_reduction <add>, %69, %cst_23 [1] : vector<16x32xf32> to vector<16xf32>
    %73 = vector.shape_cast %72 : vector<16xf32> to vector<16x1xf32>
    %cst_24 = arith.constant 3.200000e+01 : f32
    %74 = vector.broadcast %cst_24 : f32 to vector<16x1xf32>
    %75 = arith.divf %73, %74 : vector<16x1xf32>
    %76 = vector.broadcast %75 : vector<16x1xf32> to vector<16x32xf32>
    %77 = arith.subf %69, %76 : vector<16x32xf32>
    %78 = arith.mulf %77, %77 : vector<16x32xf32>
    %cst_25 = arith.constant dense<0.000000e+00> : vector<16xf32>
    %79 = vector.multi_reduction <add>, %78, %cst_25 [1] : vector<16x32xf32> to vector<16xf32>
    %80 = vector.shape_cast %79 : vector<16xf32> to vector<16x1xf32>
    %cst_26 = arith.constant 3.200000e+01 : f32
    %81 = vector.broadcast %cst_26 : f32 to vector<16x1xf32>
    %82 = arith.divf %80, %81 : vector<16x1xf32>
    %83 = vector.broadcast %75 : vector<16x1xf32> to vector<16x32xf32>
    %84 = arith.subf %69, %83 : vector<16x32xf32>
    %cst_27 = arith.constant 9.99999974E-6 : f32
    %85 = vector.broadcast %cst_27 : f32 to vector<16x1xf32>
    %86 = arith.addf %82, %85 : vector<16x1xf32>
    %87 = math.rsqrt %86 : vector<16x1xf32>
    %88 = vector.broadcast %87 : vector<16x1xf32> to vector<16x32xf32>
    %89 = arith.mulf %84, %88 : vector<16x32xf32>
    %90 = vector.broadcast %70 : vector<1x32xf32> to vector<16x32xf32>
    %91 = arith.mulf %89, %90 : vector<16x32xf32>
    %92 = vector.broadcast %71 : vector<1x32xf32> to vector<16x32xf32>
    %93 = arith.addf %91, %92 : vector<16x32xf32>
    %94 = arith.truncf %93 : vector<16x32xf32> to vector<16x32xbf16>
    %c0_28 = arith.constant 0 : index
    %c0_29 = arith.constant 0 : index
    %95 = vector.load %arg7[%c0_28, %c0_29] : memref<32x64xbf16, #tpu.memory_space<vmem>>, vector<32x64xbf16>
    %cst_30 = arith.constant dense<0.000000e+00> : vector<16x64xf32>
    %96 = tpu.matmul %94, %95, %cst_30 {dimension_numbers = #tpu.dot_dimension_numbers<[1], [0], [0], [1], [0, 0, 1, 1], [], []>} : vector<16x32xbf16>, vector<32x64xbf16>, vector<16x64xf32> -> vector<16x64xf32>
    %c0_31 = arith.constant 0 : index
    %c0_32 = arith.constant 0 : index
    %97 = vector.load %arg8[%c0_31, %c0_32] : memref<1x64xf32, #tpu.memory_space<vmem>>, vector<1x64xf32>
    %98 = vector.broadcast %97 : vector<1x64xf32> to vector<16x64xf32>
    %99 = arith.addf %96, %98 : vector<16x64xf32>
    %cst_33 = arith.constant 0.000000e+00 : f32
    %100 = vector.broadcast %cst_33 : f32 to vector<16x64xf32>
    %101 = arith.maximumf %99, %100 : vector<16x64xf32>
    %102 = arith.truncf %101 : vector<16x64xf32> to vector<16x64xbf16>
    %c0_34 = arith.constant 0 : index
    %c0_35 = arith.constant 0 : index
    %103 = vector.load %arg9[%c0_34, %c0_35] : memref<64x32xbf16, #tpu.memory_space<vmem>>, vector<64x32xbf16>
    %cst_36 = arith.constant dense<0.000000e+00> : vector<16x32xf32>
    %104 = tpu.matmul %102, %103, %cst_36 {dimension_numbers = #tpu.dot_dimension_numbers<[1], [0], [0], [1], [0, 0, 1, 1], [], []>} : vector<16x64xbf16>, vector<64x32xbf16>, vector<16x32xf32> -> vector<16x32xf32>
    %c0_37 = arith.constant 0 : index
    %c0_38 = arith.constant 0 : index
    %105 = vector.load %arg10[%c0_37, %c0_38] : memref<1x32xf32, #tpu.memory_space<vmem>>, vector<1x32xf32>
    %106 = vector.broadcast %105 : vector<1x32xf32> to vector<16x32xf32>
    %107 = arith.addf %104, %106 : vector<16x32xf32>
    %108 = arith.addf %93, %107 : vector<16x32xf32>
    %c0_39 = arith.constant 0 : index
    %c0_40 = arith.constant 0 : index
    %109 = vector.load %arg13[%c0_39, %c0_40] : memref<1x32xf32, #tpu.memory_space<vmem>>, vector<1x32xf32>
    %c0_41 = arith.constant 0 : index
    %c0_42 = arith.constant 0 : index
    %110 = vector.load %arg14[%c0_41, %c0_42] : memref<1x32xf32, #tpu.memory_space<vmem>>, vector<1x32xf32>
    %cst_43 = arith.constant dense<0.000000e+00> : vector<16xf32>
    %111 = vector.multi_reduction <add>, %108, %cst_43 [1] : vector<16x32xf32> to vector<16xf32>
    %112 = vector.shape_cast %111 : vector<16xf32> to vector<16x1xf32>
    %cst_44 = arith.constant 3.200000e+01 : f32
    %113 = vector.broadcast %cst_44 : f32 to vector<16x1xf32>
    %114 = arith.divf %112, %113 : vector<16x1xf32>
    %115 = vector.broadcast %114 : vector<16x1xf32> to vector<16x32xf32>
    %116 = arith.subf %108, %115 : vector<16x32xf32>
    %117 = arith.mulf %116, %116 : vector<16x32xf32>
    %cst_45 = arith.constant dense<0.000000e+00> : vector<16xf32>
    %118 = vector.multi_reduction <add>, %117, %cst_45 [1] : vector<16x32xf32> to vector<16xf32>
    %119 = vector.shape_cast %118 : vector<16xf32> to vector<16x1xf32>
    %cst_46 = arith.constant 3.200000e+01 : f32
    %120 = vector.broadcast %cst_46 : f32 to vector<16x1xf32>
    %121 = arith.divf %119, %120 : vector<16x1xf32>
    %122 = vector.broadcast %114 : vector<16x1xf32> to vector<16x32xf32>
    %123 = arith.subf %108, %122 : vector<16x32xf32>
    %cst_47 = arith.constant 9.99999974E-6 : f32
    %124 = vector.broadcast %cst_47 : f32 to vector<16x1xf32>
    %125 = arith.addf %121, %124 : vector<16x1xf32>
    %126 = math.rsqrt %125 : vector<16x1xf32>
    %127 = vector.broadcast %126 : vector<16x1xf32> to vector<16x32xf32>
    %128 = arith.mulf %123, %127 : vector<16x32xf32>
    %129 = vector.broadcast %109 : vector<1x32xf32> to vector<16x32xf32>
    %130 = arith.mulf %128, %129 : vector<16x32xf32>
    %131 = vector.broadcast %110 : vector<1x32xf32> to vector<16x32xf32>
    %132 = arith.addf %130, %131 : vector<16x32xf32>
    %c0_48 = arith.constant 0 : index
    %c0_49 = arith.constant 0 : index
    %133 = vector.load %arg15[%c0_48, %c0_49] : memref<16x32xf32, #tpu.memory_space<vmem>>, vector<16x32xf32>
    tpu.vector_store %arg15[%c0_48, %c0_49], %132 {strides = array<i32>} : memref<16x32xf32, #tpu.memory_space<vmem>>, vector<16x32xf32>,
    return
  }
  func.func @transform_0(%arg0: i32) -> (i32, i32) {
    %c0_i32 = arith.constant 0 : i32
    %c0_i32_0 = arith.constant 0 : i32
    return %arg0, %c0_i32 : i32, i32
  }
  func.func @transform_1(%arg0: i32) -> (i32, i32, i32) {
    %c0_i32 = arith.constant 0 : i32
    %c0_i32_0 = arith.constant 0 : i32
    %c0_i32_1 = arith.constant 0 : i32
    return %arg0, %c0_i32, %c0_i32_0 : i32, i32, i32
  }
  func.func @transform_2(%arg0: i32) -> (i32, i32) {
    %c0_i32 = arith.constant 0 : i32
    %c0_i32_0 = arith.constant 0 : i32
    %c0_i32_1 = arith.constant 0 : i32
    return %c0_i32, %c0_i32_0 : i32, i32
  }
  func.func @transform_3(%arg0: i32) -> (i32, i32) {
    %c0_i32 = arith.constant 0 : i32
    %c0_i32_0 = arith.constant 0 : i32
    %c0_i32_1 = arith.constant 0 : i32
    return %c0_i32, %c0_i32_0 : i32, i32
  }
  func.func @transform_4(%arg0: i32) -> (i32, i32, i32) {
    %c0_i32 = arith.constant 0 : i32
    %c0_i32_0 = arith.constant 0 : i32
    %c0_i32_1 = arith.constant 0 : i32
    %c0_i32_2 = arith.constant 0 : i32
    return %c0_i32, %c0_i32_0, %c0_i32_1 : i32, i32, i32
  }
  func.func @transform_5(%arg0: i32) -> (i32, i32) {
    %c0_i32 = arith.constant 0 : i32
    %c0_i32_0 = arith.constant 0 : i32
    %c0_i32_1 = arith.constant 0 : i32
    return %c0_i32, %c0_i32_0 : i32, i32
  }
  func.func @transform_6(%arg0: i32) -> (i32, i32) {
    %c0_i32 = arith.constant 0 : i32
    %c0_i32_0 = arith.constant 0 : i32
    %c0_i32_1 = arith.constant 0 : i32
    return %c0_i32, %c0_i32_0 : i32, i32
  }
  func.func @transform_7(%arg0: i32) -> (i32, i32) {
    %c0_i32 = arith.constant 0 : i32
    %c0_i32_0 = arith.constant 0 : i32
    %c0_i32_1 = arith.constant 0 : i32
    return %c0_i32, %c0_i32_0 : i32, i32
  }
  func.func @transform_8(%arg0: i32) -> (i32, i32) {
    %c0_i32 = arith.constant 0 : i32
    %c0_i32_0 = arith.constant 0 : i32
    %c0_i32_1 = arith.constant 0 : i32
    return %c0_i32, %c0_i32_0 : i32, i32
  }
  func.func @transform_9(%arg0: i32) -> (i32, i32) {
    %c0_i32 = arith.constant 0 : i32
    %c0_i32_0 = arith.constant 0 : i32
    %c0_i32_1 = arith.constant 0 : i32
    return %c0_i32, %c0_i32_0 : i32, i32
  }
  func.func @transform_10(%arg0: i32) -> (i32, i32) {
    %c0_i32 = arith.constant 0 : i32
    %c0_i32_0 = arith.constant 0 : i32
    %c0_i32_1 = arith.constant 0 : i32
    return %c0_i32, %c0_i32_0 : i32, i32
  }
  func.func @transform_11(%arg0: i32) -> (i32, i32) {
    %c0_i32 = arith.constant 0 : i32
    %c0_i32_0 = arith.constant 0 : i32
    %c0_i32_1 = arith.constant 0 : i32
    return %c0_i32, %c0_i32_0 : i32, i32
  }
  func.func @transform_12(%arg0: i32) -> (i32, i32) {
    %c0_i32 = arith.constant 0 : i32
    %c0_i32_0 = arith.constant 0 : i32
    %c0_i32_1 = arith.constant 0 : i32
    return %c0_i32, %c0_i32_0 : i32, i32
  }
  func.func @transform_13(%arg0: i32) -> (i32, i32) {
    %c0_i32 = arith.constant 0 : i32
    %c0_i32_0 = arith.constant 0 : i32
    %c0_i32_1 = arith.constant 0 : i32
    return %c0_i32, %c0_i32_0 : i32, i32
  }
  func.func @transform_14(%arg0: i32) -> (i32, i32) {
    %c0_i32 = arith.constant 0 : i32
    %c0_i32_0 = arith.constant 0 : i32
    return %arg0, %c0_i32 : i32, i32
  }
}

</mosaic_0001>

<bundles_post_ra>
// kernel: tpu_custom_call.1
= control target key start
LH: loop header
LB: loop body
LE: loop exit
PB: predicated region body
PF: predicated region fallthrough
CT: control target
= control target key end

     0   :  { %19 = vsyncpa [#allocation3], 0  ;;  %s2384_s0 = inlined_call_operand.vmem [shape: f32[16,32], index: 0, kind: input, shape index: {}]   ;;  %s2385_s1 = inlined_call_operand.hbm [shape: f32[2,1,8], index: 1, kind: input, shape index: {}]   ;;  %s2386_s2 = inlined_call_operand.vmem [shape: bf16[32,96], index: 2, kind: input, shape index: {}]   ;;  %s2387_s3 = inlined_call_operand.vmem [shape: f32[1,96], index: 3, kind: input, shape index: {}]   ;;  %s2388_s4 = inlined_call_operand.vmem [shape: bf16[4,8,32], index: 4, kind: input, shape index: {}]   ;;  %s2389_s5 = inlined_call_operand.vmem [shape: f32[1,32], index: 5, kind: input, shape index: {}]   ;;  %s2390_s6 = inlined_call_operand.hbm [shape: bf16[32,64], index: 6, kind: input, shape index: {}]   ;;  %s2391_s7 = inlined_call_operand.vmem [shape: f32[1,64], index: 7, kind: input, shape index: {}]   ;;  %s2392_s8 = inlined_call_operand.vmem [shape: bf16[64,32], index: 8, kind: input, shape index: {}]   ;;  %s2393_s9 = inlined_call_operand.vmem [shape: f32[1,32], index: 9, kind: input, shape index: {}]   ;;  %s2394_s10 = inlined_call_operand.vmem [shape: f32[1,32], index: 10, kind: input, shape index: {}]   ;;  %s2395_s11 = inlined_call_operand.vmem [shape: f32[1,32], index: 11, kind: input, shape index: {}]   ;;  %s2396_s12 = inlined_call_operand.vmem [shape: f32[1,32], index: 12, kind: input, shape index: {}]   ;;  %s2397_s13 = inlined_call_operand.vmem [shape: f32[1,32], index: 13, kind: input, shape index: {}]   ;;  %s2398_s14 = inlined_call_operand.hbm [shape: f32[16,32], index: 14, kind: output, shape index: {}]  }
   0x1   :  { %20 = vsyncpa [#allocation6], 0 }
   0x2   :  { %21 = vsyncpa [#allocation4], 0  ;;  %s2005_s29 = smov [#allocation2]  }
   0x3   :  { %s29_s30 = sshll.u32 %s2005_s29, 4  ;;  %s30_s30 = int_to_ptr.vmem [resolvable:$true] %s29_s30 }
   0x4   :  { %s1947_s15 = scalar_lea.vmem %s30_s30, 32  ;;  %p1952_p1 = scmp.lt.s32.totalorder %s30_s30, %s30_s30 }
   0x5   :  { %p1948_p0 = scmp.ne.s32.totalorder %s30_s30, %s1947_s15  ;;  %p1953_p2 = scmp.lt.s32.totalorder %s1947_s15, %s1947_s15 }
   0x7   :  { %p1954_p3 = por %p1953_p2, %p1952_p1 }
   0x9   :  { %p1955_p4 = pnand %p1954_p3, %p1948_p0 }
   0xb   :  { %1958 = shalt.err (!%p1955_p4)
}
   0xc   :  { %s2006_s16 = smov 16   ;;  %s2007_s17 = smov 1  }
   0xd   :  { %35 = dma.hbm_to_vmem [thread:$0]  %s2385_s1, 32, %s30_s30, [#allocation3], %s2006_s16, %s2006_s16, %s2007_s17  }
   0xe   :  { %s2008_s20 = smov [#allocation5]  }
   0xf   :  { %s49_s21 = sshll.u32 %s2008_s20, 4  ;;  %s50_s21 = int_to_ptr.vmem [resolvable:$true] %s49_s21 }
  0x10   :  { %s1967_s22 = scalar_lea.vmem %s50_s21, 256  ;;  %p1972_p6 = scmp.lt.s32.totalorder %s50_s21, %s50_s21 }
  0x11   :  { %p1968_p5 = scmp.ne.s32.totalorder %s50_s21, %s1967_s22  ;;  %p1973_p7 = scmp.lt.s32.totalorder %s1967_s22, %s1967_s22 }
  0x13   :  { %p1974_p8 = por %p1973_p7, %p1972_p6 }
  0x15   :  { %p1975_p9 = pnand %p1974_p8, %p1968_p5 }
  0x17   :  { %1978 = shalt.err (!%p1975_p9)
}
  0x18   :  { %s2009_s23 = smov 64   ;;  %s2010_s24 = smov 4  }
  0x19   :  { %55 = dma.hbm_to_vmem [thread:$0]  %s2390_s6, 256, %s50_s21, [#allocation6], %s2009_s23, %s2009_s23, %s2010_s24  }
  0x1a   :  { %1999 = dma.done.wait [#allocation3], 32  }
  0x1b   :  { %2000 = vsyncadd [#allocation3], 4294967264 }
  0x1c   :  { %2001 = dma.done.wait [#allocation6], 256  }
  0x1d   :  { %2002 = vsyncadd [#allocation6], 4294967040  ;;  %v2011_v0 = vmov 0.0   ;;  %vm2012_vm0 = vmmov 0   ;;  %v1891_v1 = vld [vmem:[%s2386_s2 + $0x8] sm:$0xff]   ;;  %v1892_v2 = vld [vmem:[%s2386_s2] sm:$0xff]  }
  0x1e   :  { %1667 = vmatprep.subr.bf16.mxu1 %v2011_v0  ;;  %1671 = vmatprep.mubr.msk.bf16.mxu1 %vm2012_vm0, %v2011_v0  ;;  %v2124_v3 = vld [vmem:[%s2384_s0] sm:$0xff]  ;;  %v2129_v4 = vld [vmem:[%s2384_s0 + $0x8] sm:$0xff]  ;;  %vm103_vm1 = vcmask 261120   ;;  %s2013_s0 = smov 120   ;;  %s2014_s18 = smov 96   ;;  %vm254_vm2 = vcmask 64512  }
  0x1f   :  { %1681 = vmatprep.subr.bf16.mxu0 %v2011_v0  ;;  %1683 = vmatprep.mubr.msk.bf16.mxu0 %vm2012_vm0, %v2011_v0  ;;  %v79_v5 = vpack.c.bf16 %v2129_v4, %v2124_v3  ;;  %v1575_v7 = vld [vmem:[%s2387_s3] ss:$0 sm:$0xff]  ;;  %s2015_s19 = smov 80   ;;  %s2016_s20 = smov 88   ;;  %v1580_v60 = vld [vmem:[#allocation2 + $0x1] ss:$0 sm:$0xff] }
  0x20   :  { %1668 = vmatpush3.bf16.msra.mxu1 %v1891_v1  ;;  %s2017_s3 = smov 72   ;;  %s2018_s21 = smov 112   ;;  %v1579_v59 = vld [vmem:[#allocation2] ss:$0 sm:$0xff]  ;;  %vm722_vm3 = vcmask 1043456   ;;  %vm1464_vm4 = vcmask 523264  }
  0x21   :  { %1669 = vmatprep.subr.bf16.mxu1 %v2011_v0  ;;  %s2019_s22 = smov 104   ;;  %s2020_s24 = smov 56  }
  0x22   :  { %s2022_s25 = smov 40   ;;  %s2023_s27 = smov [#allocation7]  }
  0x23   :  { %s1562_s6 = sshll.u32 %s2023_s27, 4  ;;  %s1563_s6 = int_to_ptr.vmem [resolvable:$true] %s1562_s6 }
  0x24   :  { %1670 = vmatpush3.bf16.msra.mxu1 %v1892_v2  ;;  %s1979_s28 = scalar_lea.vmem %s1563_s6, 256  ;;  %p1984_p11 = scmp.lt.s32.totalorder %s1563_s6, %s1563_s6 }
  0x25   :  { %1675 = vmatprep.subr.bf16.mxu1 %v2011_v0  ;;  %p1980_p10 = scmp.ne.s32.totalorder %s1563_s6, %s1979_s28  ;;  %p1985_p12 = scmp.lt.s32.totalorder %s1979_s28, %s1979_s28 }
  0x27   :  { %1672 = vmatmul.mubr.msk.bf16.vlgmr.msra.gmra.mxu1 %vm103_vm1, %v79_v5  ;;  %p1986_p13 = por %p1985_p12, %p1984_p11 }
  0x28   :  { %1677 = vmatprep.mubr.msk.bf16.mxu1 %vm2012_vm0, %v2011_v0 }
  0x29   :  { %p1987_p0 = pnand %p1986_p13, %p1980_p10 }
  0xe7   :  { %v141_v6 = vpop.f32.mrf.mxu1 }
  0xe8   :  { %v142_v10 = vadd.f32 %v1575_v7, %v141_v6 }
  0xe9   :  { %v1673_v8 = vpop.f32.mrf.mxu1 }
  0xea   :  { %v216_v28 = vpack.c.bf16 %v142_v10, %v142_v10 }
  0xeb   :  { %v144_v9 = vpop.f32.mrf.mxu1 }
  0xec   :  { %v145_v11 = vadd.f32 %v1575_v7, %v144_v9 }
  0xed   :  { %v1674_v12 = vpop.f32.mrf.mxu1 }
  0xee   :  { %v2141_v13 = vpack.i.bf16 %v145_v11, %v142_v10  ;;  %v217_v29 = vpack.c.bf16 %v145_v11, %v145_v11 }
  0xf0   :  { %1847 = vrot.lane.b32.xlu1 %v2141_v13, %s2013_s0  ;;  %1837 = vrot.lane.b32.xlu0 %v2141_v13, %s2014_s18 }
  0xf4   :  { %1852 = vrot.lane.b32.xlu1 %v2141_v13, %s2015_s19  ;;  %1842 = vrot.lane.b32.xlu0 %v2141_v13, %s2016_s20 }
  0xf8   :  { %1862 = vrot.lane.b32.xlu1 %v2141_v13, %s2017_s3  ;;  %1857 = vrot.lane.b32.xlu0 %v2141_v13, %s2018_s21 }
  0xfc   :  { %1867 = vrot.lane.b32.xlu0 %v2141_v13, %s2019_s22 }
 0x162   :  { %v1838_v14 = vpop.permute.xlu0 %1837  ;;  %v1848_v20 = vpop.permute.xlu1 %1847 }
 0x163   :  { %v1840_v15 = vunpack.i.h.bf16 %v1838_v14  ;;  %v1839_v16 = vunpack.i.l.bf16 %v1838_v14  ;;  %v1849_v34 = vunpack.i.l.bf16 %v1848_v20  ;;  %v1850_v35 = vunpack.i.h.bf16 %v1848_v20 }
 0x165   :  { %v225_v17 = vpack.c.bf16 %v1840_v15, %v1840_v15  ;;  %v224_v18 = vpack.c.bf16 %v1839_v16, %v1839_v16  ;;  %v218_v39 = vpack.c.bf16 %v1849_v34, %v1849_v34  ;;  %v219_v40 = vpack.c.bf16 %v1850_v35, %v1850_v35 }
 0x166   :  { %v1843_v19 = vpop.permute.xlu0 %1842  ;;  %v1853_v26 = vpop.permute.xlu1 %1852 }
 0x167   :  { %v1844_v21 = vunpack.i.l.bf16 %v1843_v19  ;;  %v259_v22 = vsel %vm254_vm2, %v224_v18, 0  ;;  %v305_v23 = vsel %vm254_vm2, %v225_v17, 0  ;;  %v1845_v24 = vunpack.i.h.bf16 %v1843_v19 }
 0x168   :  { %1676 = vmatpush3.bf16.xpose.msra.mxu1 %v259_v22  ;;  %1682 = vmatpush3.bf16.xpose.msra.mxu0 %v305_v23  ;;  %v1854_v30 = vunpack.i.l.bf16 %v1853_v26  ;;  %v1855_v32 = vunpack.i.h.bf16 %v1853_v26 }
 0x169   :  { %1687 = vmatprep.subr.bf16.mxu1 %v2011_v0  ;;  %1693 = vmatprep.subr.bf16.mxu0 %v2011_v0  ;;  %v226_v25 = vpack.c.bf16 %v1844_v21, %v1844_v21  ;;  %v227_v27 = vpack.c.bf16 %v1845_v24, %v1845_v24 }
 0x16a   :  { %v228_v36 = vpack.c.bf16 %v1854_v30, %v1854_v30  ;;  %v229_v37 = vpack.c.bf16 %v1855_v32, %v1855_v32  ;;  %v1863_v38 = vpop.permute.xlu1 %1862  ;;  %v1858_v41 = vpop.permute.xlu0 %1857 }
 0x16b   :  { %v351_v31 = vsel %vm254_vm2, %v226_v25, 0  ;;  %v397_v33 = vsel %vm254_vm2, %v227_v27, 0  ;;  %v1864_v42 = vunpack.i.l.bf16 %v1863_v38  ;;  %v1865_v44 = vunpack.i.h.bf16 %v1863_v38 }
 0x16c   :  { %v443_v43 = vsel %vm254_vm2, %v228_v36, 0  ;;  %v489_v45 = vsel %vm254_vm2, %v229_v37, 0  ;;  %v1859_v46 = vunpack.i.l.bf16 %v1858_v41  ;;  %v1860_v47 = vunpack.i.h.bf16 %v1858_v41 }
 0x16d   :  { %v230_v48 = vpack.c.bf16 %v1864_v42, %v1864_v42  ;;  %v231_v49 = vpack.c.bf16 %v1865_v44, %v1865_v44 }
 0x16e   :  { %v220_v50 = vpack.c.bf16 %v1859_v46, %v1859_v46  ;;  %v221_v51 = vpack.c.bf16 %v1860_v47, %v1860_v47  ;;  %v1868_v52 = vpop.permute.xlu0 %1867 }
 0x16f   :  { %1678 = vmatmul.mubr.msk.bf16.vlgmr.msra.gmra.mxu1 %vm254_vm2, %v216_v28  ;;  %1684 = vmatmul.mubr.msk.bf16.vlgmr.msra.gmra.mxu0 %vm254_vm2, %v217_v29  ;;  %v535_v53 = vsel %vm254_vm2, %v230_v48, 0  ;;  %v581_v54 = vsel %vm254_vm2, %v231_v49, 0  ;;  %v1869_v55 = vunpack.i.l.bf16 %v1868_v52  ;;  %v1870_v56 = vunpack.i.h.bf16 %v1868_v52 }
 0x170   :  { %1688 = vmatpush3.bf16.xpose.msra.mxu1 %v351_v31  ;;  %1694 = vmatpush3.bf16.xpose.msra.mxu0 %v397_v33 }
 0x171   :  { %1689 = vmatprep.mubr.msk.bf16.mxu1 %vm2012_vm0, %v2011_v0  ;;  %1695 = vmatprep.mubr.msk.bf16.mxu0 %vm2012_vm0, %v2011_v0  ;;  %v222_v57 = vpack.c.bf16 %v1869_v55, %v1869_v55  ;;  %v223_v58 = vpack.c.bf16 %v1870_v56, %v1870_v56 }
 0x172   :  { %1699 = vmatprep.subr.bf16.mxu1 %v2011_v0  ;;  %1705 = vmatprep.subr.bf16.mxu0 %v2011_v0 }
 0x177   :  { %1690 = vmatmul.mubr.msk.bf16.vlgmr.msra.gmra.mxu1 %vm254_vm2, %v218_v39  ;;  %1696 = vmatmul.mubr.msk.bf16.vlgmr.msra.gmra.mxu0 %vm254_vm2, %v219_v40 }
 0x178   :  { %1700 = vmatpush3.bf16.xpose.msra.mxu1 %v443_v43  ;;  %1706 = vmatpush3.bf16.xpose.msra.mxu0 %v489_v45 }
 0x179   :  { %1701 = vmatprep.mubr.msk.bf16.mxu1 %vm2012_vm0, %v2011_v0  ;;  %1707 = vmatprep.mubr.msk.bf16.mxu0 %vm2012_vm0, %v2011_v0 }
 0x17a   :  { %1711 = vmatprep.subr.bf16.mxu1 %v2011_v0  ;;  %1717 = vmatprep.subr.bf16.mxu0 %v2011_v0 }
 0x17f   :  { %1702 = vmatmul.mubr.msk.bf16.vlgmr.msra.gmra.mxu1 %vm254_vm2, %v220_v50  ;;  %1708 = vmatmul.mubr.msk.bf16.vlgmr.msra.gmra.mxu0 %vm254_vm2, %v221_v51 }
 0x180   :  { %1712 = vmatpush3.bf16.xpose.msra.mxu1 %v535_v53  ;;  %1718 = vmatpush3.bf16.xpose.msra.mxu0 %v581_v54 }
 0x181   :  { %1713 = vmatprep.mubr.msk.bf16.mxu1 %vm2012_vm0, %v2011_v0  ;;  %1719 = vmatprep.mubr.msk.bf16.mxu0 %vm2012_vm0, %v2011_v0 }
 0x182   :  { %1723 = vmatprep.subr.bf16.mxu1 %v2011_v0  ;;  %1729 = vmatprep.subr.bf16.mxu0 %v2011_v0 }
 0x187   :  { %1714 = vmatmul.mubr.msk.bf16.vlgmr.msra.gmra.mxu1 %vm254_vm2, %v222_v57  ;;  %1720 = vmatmul.mubr.msk.bf16.vlgmr.msra.gmra.mxu0 %vm254_vm2, %v223_v58 }
 0x188   :  { %1725 = vmatprep.mubr.msk.bf16.mxu1 %vm2012_vm0, %v2011_v0  ;;  %1731 = vmatprep.mubr.msk.bf16.mxu0 %vm2012_vm0, %v2011_v0 }
 0x22f   :  { %v295_v61 = vpop.f32.mrf.mxu1  ;;  %v341_v63 = vpop.f32.mrf.mxu0 }
 0x230   :  { %v296_v62 = vadd.f32 %v1579_v59, %v295_v61  ;;  %v342_v1 = vadd.f32 %v1580_v60, %v341_v63 }
 0x231   :  { %v1679_v2 = vpop.f32.mrf.mxu1  ;;  %v1685_v5 = vpop.f32.mrf.mxu0 }
 0x232   :  { %v623_v6 = vsel %vm254_vm2, %v296_v62, -inf  ;;  %v626_v7 = vsel %vm254_vm2, %v342_v1, -inf }
 0x233   :  { %624 = vmax.xlane.f32.xlu1 %v623_v6  ;;  %v298_v8 = vpop.f32.mrf.mxu1  ;;  %627 = vmax.xlane.f32.xlu0 %v626_v7  ;;  %v344_v9 = vpop.f32.mrf.mxu0 }
 0x235   :  { %v1680_v10 = vpop.f32.mrf.mxu1  ;;  %v1686_v11 = vpop.f32.mrf.mxu0 }
 0x237   :  { %v387_v12 = vpop.f32.mrf.mxu1  ;;  %v433_v15 = vpop.f32.mrf.mxu0 }
 0x238   :  { %v2192_v14 = vadd.f32 %v1579_v59, %v387_v12  ;;  %v434_v16 = vadd.f32 %v1580_v60, %v433_v15 }
 0x239   :  { %v1691_v17 = vpop.f32.mrf.mxu1  ;;  %v1697_v18 = vpop.f32.mrf.mxu0 }
 0x23a   :  { %v629_v19 = vsel %vm254_vm2, %v2192_v14, -inf  ;;  %v632_v20 = vsel %vm254_vm2, %v434_v16, -inf }
 0x23b   :  { %630 = vmax.xlane.f32.xlu0 %v629_v19  ;;  %v390_v21 = vpop.f32.mrf.mxu1  ;;  %v436_v22 = vpop.f32.mrf.mxu0  ;;  %633 = vmax.xlane.f32.xlu1 %v632_v20 }
 0x23d   :  { %v1692_v23 = vpop.f32.mrf.mxu1  ;;  %v1698_v24 = vpop.f32.mrf.mxu0 }
 0x23f   :  { %v479_v25 = vpop.f32.mrf.mxu1  ;;  %v525_v27 = vpop.f32.mrf.mxu0 }
 0x240   :  { %v2197_v26 = vadd.f32 %v1579_v59, %v479_v25  ;;  %v526_v28 = vadd.f32 %v1580_v60, %v525_v27 }
 0x241   :  { %v1703_v29 = vpop.f32.mrf.mxu1  ;;  %v1709_v30 = vpop.f32.mrf.mxu0 }
 0x242   :  { %v635_v31 = vsel %vm254_vm2, %v2197_v26, -inf  ;;  %v638_v32 = vsel %vm254_vm2, %v526_v28, -inf }
 0x243   :  { %636 = vmax.xlane.f32.xlu0 %v635_v31  ;;  %v482_v33 = vpop.f32.mrf.mxu1  ;;  %v528_v34 = vpop.f32.mrf.mxu0  ;;  %639 = vmax.xlane.f32.xlu1 %v638_v32 }
 0x245   :  { %v1704_v35 = vpop.f32.mrf.mxu1  ;;  %v1710_v36 = vpop.f32.mrf.mxu0 }
 0x247   :  { %v571_v37 = vpop.f32.mrf.mxu1  ;;  %v617_v39 = vpop.f32.mrf.mxu0 }
 0x248   :  { %v572_v38 = vadd.f32 %v1579_v59, %v571_v37  ;;  %v618_v40 = vadd.f32 %v1580_v60, %v617_v39 }
 0x249   :  { %v1715_v41 = vpop.f32.mrf.mxu1  ;;  %v1721_v42 = vpop.f32.mrf.mxu0 }
 0x24a   :  { %v641_v43 = vsel %vm254_vm2, %v572_v38, -inf  ;;  %v644_v44 = vsel %vm254_vm2, %v618_v40, -inf }
 0x24b   :  { %642 = vmax.xlane.f32.xlu0 %v641_v43  ;;  %v574_v45 = vpop.f32.mrf.mxu1  ;;  %v620_v46 = vpop.f32.mrf.mxu0  ;;  %645 = vmax.xlane.f32.xlu1 %v644_v44 }
 0x24d   :  { %v1716_v47 = vpop.f32.mrf.mxu1  ;;  %v1722_v48 = vpop.f32.mrf.mxu0 }
 0x2bc   :  { %v625_v49 = vpop.xlane.xlu1 %624  ;;  %v628_v50 = vpop.xlane.xlu0 %627 }
 0x2bd   :  { %v647_v51 = vsub.f32 %v296_v62, %v625_v49  ;;  %v648_v52 = vsub.f32 %v342_v1, %v628_v50 }
 0x2bf   :  { %v655_v53 = vmul.f32 1.442695, %v647_v51  ;;  %v657_v54 = vmul.f32 1.442695, %v648_v52 }
 0x2c1   :  { %1899 = vpow2.f32 %v655_v53 }
 0x2c2   :  { %1901 = vpow2.f32 %v657_v54 }
 0x2c4   :  { %v634_v55 = vpop.xlane.xlu1 %633  ;;  %v631_v58 = vpop.xlane.xlu0 %630 }
 0x2c5   :  { %v650_v56 = vsub.f32 %v434_v16, %v634_v55  ;;  %v649_v22 = vsub.f32 %v2192_v14, %v631_v58 }
 0x2c7   :  { %v661_v57 = vmul.f32 1.442695, %v650_v56  ;;  %v659_v23 = vmul.f32 1.442695, %v649_v22 }
 0x2c9   :  { %1903 = vpow2.f32 %v661_v57 }
 0x2cc   :  { %v640_v59 = vpop.xlane.xlu1 %639  ;;  %v637_v1 = vpop.xlane.xlu0 %636 }
 0x2cd   :  { %v652_v61 = vsub.f32 %v526_v28, %v640_v59  ;;  %v651_v24 = vsub.f32 %v2197_v26, %v637_v1 }
 0x2ce   :  { %v2204_v60 = vpop.eup %1899 }
 0x2cf   :  { %v2206_v63 = vpop.eup %1901  ;;  %v671_v2 = vsel %vm254_vm2, %v2204_v60, 0.0  ;;  %v665_v62 = vmul.f32 1.442695, %v652_v61  ;;  %v663_v25 = vmul.f32 1.442695, %v651_v24 }
 0x2d0   :  { %v674_v5 = vsel %vm254_vm2, %v2206_v63, 0.0  ;;  %672 = vadd.xlane.f32.xlu0 %v671_v2 }
 0x2d1   :  { %675 = vadd.xlane.f32.xlu1 %v674_v5  ;;  %1905 = vpow2.f32 %v665_v62 }
 0x2d4   :  { %v643_v6 = vpop.xlane.xlu0 %642  ;;  %v646_v7 = vpop.xlane.xlu1 %645 }
 0x2d5   :  { %v653_v8 = vsub.f32 %v572_v38, %v643_v6  ;;  %v654_v9 = vsub.f32 %v618_v40, %v646_v7 }
 0x2d6   :  { %v2212_v10 = vpop.eup %1903 }
 0x2d7   :  { %v667_v11 = vmul.f32 1.442695, %v653_v8  ;;  %v669_v12 = vmul.f32 1.442695, %v654_v9  ;;  %v680_v15 = vsel %vm254_vm2, %v2212_v10, 0.0 }
 0x2d8   :  { %681 = vadd.xlane.f32.xlu1 %v680_v15 }
 0x2d9   :  { %1907 = vpow2.f32 %v667_v11 }
 0x2da   :  { %1909 = vpow2.f32 %v669_v12 }
 0x2db   :  { %1911 = vpow2.f32 %v659_v23 }
 0x2dc   :  { %1913 = vpow2.f32 %v663_v25 }
 0x2de   :  { %v2216_v16 = vpop.eup %1905 }
 0x2df   :  { %v686_v17 = vsel %vm254_vm2, %v2216_v16, 0.0 }
 0x2e0   :  { %687 = vadd.xlane.f32.xlu1 %v686_v17 }
 0x2e6   :  { %v2220_v18 = vpop.eup %1907  ;;  %1872 = vrot.lane.b32.xlu0 %v2141_v13, %s2009_s23  ;;  %s2021_s23 = smov 48  }
 0x2e7   :  { %v689_v19 = vsel %vm254_vm2, %v2220_v18, 0.0  ;;  %v2226_v20 = vpop.eup %1909 }
 0x2e8   :  { %690 = vadd.xlane.f32.xlu1 %v689_v19  ;;  %v692_v21 = vsel %vm254_vm2, %v2226_v20, 0.0  ;;  %v2233_v27 = vpop.eup %1911 }
 0x2e9   :  { %v677_v28 = vsel %vm254_vm2, %v2233_v27, 0.0  ;;  %v2237_v29 = vpop.eup %1913 }
 0x2ea   :  { %v683_v14 = vsel %vm254_vm2, %v2237_v29, 0.0 }
 0x2ec   :  { %693 = vadd.xlane.f32.xlu1 %v692_v21 }
 0x2fd   :  { %1877 = vrot.lane.b32.xlu1 %v2141_v13, %s2020_s24 }
 0x305   :  { %678 = vadd.xlane.f32.xlu0 %v677_v28 }
 0x309   :  { %684 = vadd.xlane.f32.xlu0 %v683_v14 }
 0x31f   :  { %1882 = vrot.lane.b32.xlu0 %v2141_v13, %s2021_s23 }
 0x323   :  { %1887 = vrot.lane.b32.xlu0 %v2141_v13, %s2022_s25 }
 0x359   :  { %v673_v26 = vpop.xlane.xlu0 %672 }
 0x35a   :  { %v676_v30 = vpop.xlane.xlu1 %675  ;;  %1915 = vrcp.f32 %v673_v26 }
 0x35b   :  { %1917 = vrcp.f32 %v676_v30 }
 0x35d   :  { %v1873_v31 = vpop.permute.xlu0 %1872 }
 0x35e   :  { %v1875_v32 = vunpack.i.h.bf16 %v1873_v31  ;;  %v1874_v33 = vunpack.i.l.bf16 %v1873_v31 }
 0x360   :  { %v233_v34 = vpack.c.bf16 %v1875_v32, %v1875_v32  ;;  %v232_v35 = vpack.c.bf16 %v1874_v33, %v1874_v33  ;;  %v1094_v32 = vld [vmem:[%s2388_s4 + $0x8] sm:$0xf] }
 0x361   :  { %v682_v40 = vpop.xlane.xlu1 %681 }
 0x362   :  { %v724_v36 = vsel %vm722_vm3, %v232_v35, 0  ;;  %v770_v37 = vsel %vm722_vm3, %v233_v34, 0  ;;  %1919 = vrcp.f32 %v682_v40 }
 0x363   :  { %1724 = vmatpush3.bf16.msra.mxu1 %v724_v36  ;;  %1730 = vmatpush3.bf16.msra.mxu0 %v770_v37  ;;  %v1194_v37 = vsel %vm722_vm3, %v1094_v32, 0 }
 0x364   :  { %1735 = vmatprep.subr.bf16.mxu1 %v2011_v0  ;;  %1741 = vmatprep.subr.bf16.mxu0 %v2011_v0 }
 0x367   :  { %v1916_v13 = vpop.eup %1915 }
 0x368   :  { %v1918_v38 = vpop.eup %1917  ;;  %v703_v39 = vmul.f32 %v1916_v13, %v2204_v60 }
 0x369   :  { %v704_v41 = vmul.f32 %v1918_v38, %v2206_v63  ;;  %v688_v44 = vpop.xlane.xlu1 %687 }
 0x36a   :  { %v711_v42 = vpack.c.bf16 %v703_v39, %v703_v39  ;;  %1921 = vrcp.f32 %v688_v44 }
 0x36b   :  { %v712_v43 = vpack.c.bf16 %v704_v41, %v704_v41 }
 0x36c   :  { %1726 = vmatmul.mubr.msk.bf16.vlgmr.msra.gmra.mxu1 %vm254_vm2, %v711_v42 }
 0x36d   :  { %1732 = vmatmul.mubr.msk.bf16.vlgmr.msra.gmra.mxu0 %vm254_vm2, %v712_v43  ;;  %1737 = vmatprep.mubr.msk.bf16.mxu1 %vm2012_vm0, %v2011_v0 }
 0x36e   :  { %1743 = vmatprep.mubr.msk.bf16.mxu0 %vm2012_vm0, %v2011_v0 }
 0x36f   :  { %v1920_v47 = vpop.eup %1919 }
 0x370   :  { %v706_v53 = vmul.f32 %v1920_v47, %v2212_v10  ;;  %v1095_v47 = vld [vmem:[%s2388_s4 + $0xc] sm:$0xf] }
 0x371   :  { %v691_v45 = vpop.xlane.xlu1 %690 }
 0x372   :  { %v714_v56 = vpack.c.bf16 %v706_v53, %v706_v53 }
 0x375   :  { %v694_v46 = vpop.xlane.xlu1 %693 }
 0x377   :  { %v1922_v59 = vpop.eup %1921 }
 0x378   :  { %v708_v62 = vmul.f32 %v1922_v59, %v2216_v16 }
 0x379   :  { %v1878_v48 = vpop.permute.xlu1 %1877 }
 0x37a   :  { %v1880_v49 = vunpack.i.h.bf16 %v1878_v48  ;;  %v1879_v50 = vunpack.i.l.bf16 %v1878_v48  ;;  %v716_v10 = vpack.c.bf16 %v708_v62, %v708_v62 }
 0x37c   :  { %v235_v51 = vpack.c.bf16 %v1880_v49, %v1880_v49  ;;  %v234_v52 = vpack.c.bf16 %v1879_v50, %v1879_v50 }
 0x37e   :  { %v816_v54 = vsel %vm722_vm3, %v234_v52, 0  ;;  %v862_v55 = vsel %vm722_vm3, %v235_v51, 0  ;;  %v1241_v51 = vsel %vm722_vm3, %v1095_v47, 0 }
 0x37f   :  { %1736 = vmatpush3.bf16.msra.mxu1 %v816_v54  ;;  %1742 = vmatpush3.bf16.msra.mxu0 %v862_v55 }
 0x380   :  { %1753 = vmatprep.subr.bf16.mxu0 %v2011_v0  ;;  %1747 = vmatprep.subr.bf16.mxu1 %v2011_v0 }
 0x382   :  { %1744 = vmatmul.mubr.msk.bf16.vlgmr.msra.gmra.mxu0 %vm254_vm2, %v714_v56 }
 0x383   :  { %1755 = vmatprep.mubr.msk.bf16.mxu0 %vm2012_vm0, %v2011_v0 }
 0x38e   :  { %v679_v57 = vpop.xlane.xlu0 %678 }
 0x38f   :  { %1923 = vrcp.f32 %v679_v57 }
 0x390   :  { %1925 = vrcp.f32 %v694_v46 }
 0x392   :  { %v685_v58 = vpop.xlane.xlu0 %684 }
 0x393   :  { %1927 = vrcp.f32 %v685_v58 }
 0x394   :  { %1929 = vrcp.f32 %v691_v45 }
 0x396   :  { %v1883_v60 = vpop.permute.xlu0 %1882 }
 0x397   :  { %v1885_v61 = vunpack.i.h.bf16 %v1883_v60  ;;  %v1884_v2 = vunpack.i.l.bf16 %v1883_v60 }
 0x399   :  { %v237_v63 = vpack.c.bf16 %v1885_v61, %v1885_v61  ;;  %v236_v8 = vpack.c.bf16 %v1884_v2, %v1884_v2 }
 0x39a   :  { %v1888_v1 = vpop.permute.xlu0 %1887 }
 0x39b   :  { %v1890_v5 = vunpack.i.h.bf16 %v1888_v1  ;;  %v954_v6 = vsel %vm722_vm3, %v237_v63, 0  ;;  %v1889_v19 = vunpack.i.l.bf16 %v1888_v1  ;;  %v908_v21 = vsel %vm722_vm3, %v236_v8, 0 }
 0x39c   :  { %v1924_v7 = vpop.eup %1923  ;;  %1754 = vmatpush3.bf16.msra.mxu0 %v954_v6 }
 0x39d   :  { %v239_v9 = vpack.c.bf16 %v1890_v5, %v1890_v5  ;;  %1765 = vmatprep.subr.bf16.mxu0 %v2011_v0  ;;  %v705_v11 = vmul.f32 %v1924_v7, %v2233_v27  ;;  %v1926_v12 = vpop.eup %1925  ;;  %v238_v24 = vpack.c.bf16 %v1889_v19, %v1889_v19 }
 0x39e   :  { %v710_v22 = vmul.f32 %v1926_v12, %v2226_v20 }
 0x39f   :  { %1756 = vmatmul.mubr.msk.bf16.vlgmr.msra.gmra.mxu0 %vm254_vm2, %v716_v10  ;;  %v1046_v15 = vsel %vm722_vm3, %v239_v9, 0  ;;  %v713_v16 = vpack.c.bf16 %v705_v11, %v705_v11  ;;  %v1000_v20 = vsel %vm722_vm3, %v238_v24, 0 }
 0x3a0   :  { %v1928_v17 = vpop.eup %1927  ;;  %1766 = vmatpush3.bf16.msra.mxu0 %v1046_v15  ;;  %1767 = vmatprep.mubr.msk.bf16.mxu0 %vm2012_vm0, %v2011_v0  ;;  %v718_v25 = vpack.c.bf16 %v710_v22, %v710_v22 }
 0x3a1   :  { %1738 = vmatmul.mubr.msk.bf16.vlgmr.msra.gmra.mxu1 %vm254_vm2, %v713_v16  ;;  %1777 = vmatprep.subr.bf16.mxu0 %v2011_v0  ;;  %v707_v23 = vmul.f32 %v1928_v17, %v2237_v29  ;;  %v1930_v28 = vpop.eup %1929  ;;  %v1092_v29 = vld [vmem:[%s2388_s4] sm:$0xf] }
 0x3a2   :  { %1748 = vmatpush3.bf16.msra.mxu1 %v908_v21  ;;  %1749 = vmatprep.mubr.msk.bf16.mxu1 %vm2012_vm0, %v2011_v0  ;;  %v709_v14 = vmul.f32 %v1930_v28, %v2220_v18  ;;  %v1100_v30 = vsel %vm722_vm3, %v1092_v29, 0  ;;  %v1093_v18 = vld [vmem:[%s2388_s4 + $0x4] sm:$0xf] }
 0x3a3   :  { %1759 = vmatprep.subr.bf16.mxu1 %v2011_v0  ;;  %v715_v27 = vpack.c.bf16 %v707_v23, %v707_v23  ;;  %v1147_v31 = vsel %vm722_vm3, %v1093_v18, 0 }
 0x3a4   :  { %v717_v26 = vpack.c.bf16 %v709_v14, %v709_v14 }
 0x3a7   :  { %1768 = vmatmul.mubr.msk.bf16.vlgmr.msra.gmra.mxu0 %vm254_vm2, %v718_v25 }
 0x3a8   :  { %1779 = vmatprep.mubr.msk.bf16.mxu0 %vm2012_vm0, %v2011_v0  ;;  %1778 = vmatpush3.bf16.msra.mxu0 %v1147_v31 }
 0x3a9   :  { %1750 = vmatmul.mubr.msk.bf16.vlgmr.msra.gmra.mxu1 %vm254_vm2, %v715_v27  ;;  %1789 = vmatprep.subr.bf16.mxu0 %v2011_v0 }
 0x3aa   :  { %1760 = vmatpush3.bf16.msra.mxu1 %v1000_v20  ;;  %1761 = vmatprep.mubr.msk.bf16.mxu1 %vm2012_vm0, %v2011_v0 }
 0x3ab   :  { %1771 = vmatprep.subr.bf16.mxu1 %v2011_v0 }
 0x3b1   :  { %1762 = vmatmul.mubr.msk.bf16.vlgmr.msra.gmra.mxu1 %vm254_vm2, %v717_v26 }
 0x3b2   :  { %1772 = vmatpush3.bf16.msra.mxu1 %v1100_v30  ;;  %1773 = vmatprep.mubr.msk.bf16.mxu1 %vm2012_vm0, %v2011_v0 }
 0x3b3   :  { %1783 = vmatprep.subr.bf16.mxu1 %v2011_v0 }
 0x42c   :  { %v760_v33 = vpop.f32.mrf.mxu1 }
 0x42d   :  { %v806_v34 = vpop.f32.mrf.mxu0 }
 0x42e   :  { %v1088_v35 = vpack.c.bf16 %v806_v34, %v760_v33  ;;  %v1727_v36 = vpop.f32.mrf.mxu1  ;;  %v1601_v33 = vld [vmem:[%s2389_s5] ss:$0 sm:$0xff] }
 0x42f   :  { %v1733_v13 = vpop.f32.mrf.mxu0 }
 0x430   :  { %1774 = vmatmul.mubr.msk.bf16.vlgmr.msra.gmra.mxu1 %vm254_vm2, %v1088_v35  ;;  %v763_v38 = vpop.f32.mrf.mxu1 }
 0x431   :  { %v809_v39 = vpop.f32.mrf.mxu0  ;;  %1784 = vmatpush3.bf16.msra.mxu1 %v1194_v37  ;;  %1785 = vmatprep.mubr.msk.bf16.mxu1 %vm2012_vm0, %v2011_v0 }
 0x432   :  { %v1728_v40 = vpop.f32.mrf.mxu1  ;;  %1795 = vmatprep.subr.bf16.mxu1 %v2011_v0 }
 0x433   :  { %v1734_v41 = vpop.f32.mrf.mxu0 }
 0x442   :  { %v898_v42 = vpop.f32.mrf.mxu0 }
 0x444   :  { %v1745_v43 = vpop.f32.mrf.mxu0 }
 0x446   :  { %v901_v44 = vpop.f32.mrf.mxu0 }
 0x448   :  { %v1746_v45 = vpop.f32.mrf.mxu0 }
 0x45f   :  { %v990_v46 = vpop.f32.mrf.mxu0 }
 0x461   :  { %v852_v48 = vpop.f32.mrf.mxu1  ;;  %v1757_v49 = vpop.f32.mrf.mxu0 }
 0x462   :  { %v1089_v50 = vpack.c.bf16 %v898_v42, %v852_v48 }
 0x463   :  { %v1739_v52 = vpop.f32.mrf.mxu1  ;;  %v993_v53 = vpop.f32.mrf.mxu0 }
 0x464   :  { %1780 = vmatmul.mubr.msk.bf16.vlgmr.msra.gmra.mxu0 %vm254_vm2, %v1089_v50 }
 0x465   :  { %v855_v54 = vpop.f32.mrf.mxu1  ;;  %v1758_v55 = vpop.f32.mrf.mxu0  ;;  %1790 = vmatpush3.bf16.msra.mxu0 %v1241_v51  ;;  %1791 = vmatprep.mubr.msk.bf16.mxu0 %vm2012_vm0, %v2011_v0 }
 0x466   :  { %1803 = vmatprep.subr.bf16.mxu0 %v2011_v0 }
 0x467   :  { %v1740_v56 = vpop.f32.mrf.mxu1  ;;  %v1082_v57 = vpop.f32.mrf.mxu0 }
 0x468   :  { %v1893_v56 = vld [vmem:[#allocation5 + $0x8] sm:$0xff]  }
 0x469   :  { %v944_v58 = vpop.f32.mrf.mxu1  ;;  %v1769_v59 = vpop.f32.mrf.mxu0 }
 0x46a   :  { %v1090_v60 = vpack.c.bf16 %v990_v46, %v944_v58 }
 0x46b   :  { %v1751_v61 = vpop.f32.mrf.mxu1  ;;  %v1085_v63 = vpop.f32.mrf.mxu0 }
 0x46c   :  { %1786 = vmatmul.mubr.msk.bf16.vlgmr.msra.gmra.mxu1 %vm254_vm2, %v1090_v60 }
 0x46d   :  { %v947_v2 = vpop.f32.mrf.mxu1  ;;  %v1770_v62 = vpop.f32.mrf.mxu0  ;;  %1799 = vmatprep.mubr.msk.bf16.mxu1 %vm2012_vm0, %v2011_v0  ;;  %1796 = vmatpush3.bf16.msra.mxu1 %v1893_v56 }
 0x46e   :  { %1797 = vmatprep.subr.bf16.mxu1 %v2011_v0 }
 0x46f   :  { %v1752_v1 = vpop.f32.mrf.mxu1 }
 0x471   :  { %v1036_v5 = vpop.f32.mrf.mxu1 }
 0x472   :  { %v1091_v6 = vpack.c.bf16 %v1082_v57, %v1036_v5  ;;  %v1895_v57 = vld [vmem:[%s2392_s8 + $0x18] sm:$0xff]   ;;  %v1602_v5 = vld [vmem:[%s2394_s10] ss:$0 sm:$0xff] }
 0x473   :  { %v1763_v7 = vpop.f32.mrf.mxu1 }
 0x474   :  { %1792 = vmatmul.mubr.msk.bf16.vlgmr.msra.gmra.mxu0 %vm254_vm2, %v1091_v6 }
 0x475   :  { %v1039_v8 = vpop.f32.mrf.mxu1  ;;  %1811 = vmatprep.mubr.msk.bf16.mxu0 %vm2012_vm0, %v2011_v0  ;;  %1804 = vmatpush3.bf16.msra.mxu0 %v1895_v57 }
 0x476   :  { %1805 = vmatprep.subr.bf16.mxu0 %v2011_v0 }
 0x477   :  { %v1764_v9 = vpop.f32.mrf.mxu1 }
 0x478   :  { %v1603_v9 = vld [vmem:[%s2395_s11] ss:$0 sm:$0xff] }
 0x4f0   :  { %v1136_v10 = vpop.f32.mrf.mxu1 }
 0x4f1   :  { %v1284_v27 = vsel %vm103_vm1, %v1136_v10, 0.0 }
 0x4f2   :  { %v1775_v11 = vpop.f32.mrf.mxu1 }
 0x4f4   :  { %v1139_v12 = vpop.f32.mrf.mxu1 }
 0x4f5   :  { %v1291_v18 = vsel %vm103_vm1, %v1139_v12, 0.0 }
 0x4f6   :  { %v1776_v15 = vpop.f32.mrf.mxu1 }
 0x524   :  { %v1183_v16 = vpop.f32.mrf.mxu0 }
 0x525   :  { %v1285_v24 = vsel %vm103_vm1, %v1183_v16, 0.0  ;;  %v1896_v16 = vld [vmem:[%s2392_s8 + $0x10] sm:$0xff]  }
 0x526   :  { %v1781_v17 = vpop.f32.mrf.mxu0  ;;  %v1286_v20 = vadd.f32 %v1285_v24, %v1284_v27  ;;  %1806 = vmatpush3.bf16.msra.mxu0 %v1896_v16 }
 0x527   :  { %1807 = vmatprep.subr.bf16.mxu0 %v2011_v0  ;;  %v1897_v17 = vld [vmem:[%s2392_s8 + $0x8] sm:$0xff]  }
 0x528   :  { %v1186_v19 = vpop.f32.mrf.mxu0 }
 0x529   :  { %v1292_v29 = vsel %vm103_vm1, %v1186_v19, 0.0  ;;  %v1898_v19 = vld [vmem:[%s2392_s8] sm:$0xff]  }
 0x52a   :  { %v1782_v21 = vpop.f32.mrf.mxu0  ;;  %v1293_v34 = vadd.f32 %v1292_v29, %v1291_v18  ;;  %1808 = vmatpush3.bf16.msra.mxu0 %v1897_v17 }
 0x52b   :  { %1809 = vmatprep.subr.bf16.mxu0 %v2011_v0  ;;  %v1604_v21 = vld [vmem:[%s2391_s7] ss:$0 sm:$0xff] }
 0x52c   :  { %v1230_v22 = vpop.f32.mrf.mxu1  ;;  %v1608_v0 = vld [vmem:[%s2393_s9] ss:$0 sm:$0xff] }
 0x52d   :  { %v1287_v28 = vsel %vm103_vm1, %v1230_v22, 0.0 }
 0x52e   :  { %v1787_v23 = vpop.f32.mrf.mxu1  ;;  %v1288_v26 = vadd.f32 %v1287_v28, %v1286_v20  ;;  %1810 = vmatpush3.bf16.msra.mxu0 %v1898_v19 }
 0x530   :  { %v1233_v25 = vpop.f32.mrf.mxu1 }
 0x531   :  { %v1294_v31 = vsel %vm103_vm1, %v1233_v25, 0.0 }
 0x532   :  { %v1788_v14 = vpop.f32.mrf.mxu1  ;;  %v1295_v37 = vadd.f32 %v1294_v31, %v1293_v34 }
 0x534   :  { %v1277_v30 = vpop.f32.mrf.mxu0 }
 0x535   :  { %v1289_v32 = vsel %vm103_vm1, %v1277_v30, 0.0 }
 0x536   :  { %v1290_v35 = vadd.f32 %v1289_v32, %v1288_v26  ;;  %v1793_v36 = vpop.f32.mrf.mxu0 }
 0x538   :  { %v1305_v13 = vadd.f32 %v1601_v33, %v1290_v35  ;;  %v1280_v38 = vpop.f32.mrf.mxu0 }
 0x539   :  { %v1296_v39 = vsel %vm103_vm1, %v1280_v38, 0.0 }
 0x53a   :  { %v1297_v40 = vadd.f32 %v1296_v39, %v1295_v37  ;;  %v1794_v41 = vpop.f32.mrf.mxu0  ;;  %v1307_v42 = vadd.f32 %v1305_v13, %v2124_v3 }
 0x53c   :  { %v1306_v43 = vadd.f32 %v1601_v33, %v1297_v40  ;;  %v1311_v44 = vsel %vm103_vm1, %v1307_v42, 0.0 }
 0x53d   :  { %1312 = vadd.xlane.f32.xlu1 %v1311_v44 }
 0x53e   :  { %v1308_v45 = vadd.f32 %v1306_v43, %v2129_v4  ;;  %v1894_v4 = vld [vmem:[#allocation5] sm:$0xff]  }
 0x53f   :  { %1798 = vmatpush3.bf16.msra.mxu1 %v1894_v4 }
 0x540   :  { %v1314_v46 = vsel %vm103_vm1, %v1308_v45, 0.0 }
 0x541   :  { %1315 = vadd.xlane.f32.xlu0 %v1314_v46 }
 0x5c6   :  { %v1313_v47 = vpop.xlane.xlu1 %1312 }
 0x5c7   :  { %v1318_v48 = vmul.f32 0.03125, %v1313_v47 }
 0x5c9   :  { %v1320_v49 = vsub.f32 %v1307_v42, %v1318_v48 }
 0x5ca   :  { %v1316_v50 = vpop.xlane.xlu0 %1315 }
 0x5cb   :  { %v1319_v51 = vmul.f32 0.03125, %v1316_v50  ;;  %v1322_v52 = vmul.f32 %v1320_v49, %v1320_v49 }
 0x5cd   :  { %v1321_v53 = vsub.f32 %v1308_v45, %v1319_v51  ;;  %v1324_v54 = vsel %vm103_vm1, %v1322_v52, 0.0 }
 0x5ce   :  { %1325 = vadd.xlane.f32.xlu0 %v1324_v54  ;;  %v1614_v54 = vld [vmem:[%s2396_s12] ss:$0 sm:$0xff] }
 0x5cf   :  { %v1323_v3 = vmul.f32 %v1321_v53, %v1321_v53 }
 0x5d1   :  { %v1327_v55 = vsel %vm103_vm1, %v1323_v3, 0.0 }
 0x5d2   :  { %1328 = vadd.xlane.f32.xlu1 %v1327_v55  ;;  %v1615_v55 = vld [vmem:[%s2397_s13] ss:$0 sm:$0xff] }
 0x657   :  { %v1326_v58 = vpop.xlane.xlu0 %1325 }
 0x658   :  { %v1330_v59 = vmul.f32 0.03125, %v1326_v58 }
 0x65a   :  { %v1332_v60 = vadd.f32 1e-05, %v1330_v59 }
 0x65b   :  { %v1329_v61 = vpop.xlane.xlu1 %1328 }
 0x65c   :  { %1931 = vrsqrt.f32 %v1332_v60  ;;  %v1331_v63 = vmul.f32 0.03125, %v1329_v61 }
 0x65e   :  { %v1333_v2 = vadd.f32 1e-05, %v1331_v63 }
 0x660   :  { %1933 = vrsqrt.f32 %v1333_v2 }
 0x669   :  { %v1932_v62 = vpop.eup %1931 }
 0x66a   :  { %v1336_v1 = vmul.f32 %v1932_v62, %v1320_v49 }
 0x66c   :  { %v1344_v8 = vmul.f32 %v1602_v5, %v1336_v1 }
 0x66d   :  { %v1934_v6 = vpop.eup %1933 }
 0x66e   :  { %v1337_v7 = vmul.f32 %v1934_v6, %v1321_v53  ;;  %v1352_v11 = vadd.f32 %v1603_v9, %v1344_v8 }
 0x670   :  { %v1345_v10 = vmul.f32 %v1602_v5, %v1337_v7 }
 0x672   :  { %v1353_v12 = vadd.f32 %v1603_v9, %v1345_v10 }
 0x674   :  { %v1354_v15 = vpack.c.bf16 %v1353_v12, %v1352_v11 }
 0x676   :  { %1800 = vmatmul.mubr.msk.bf16.vlgmr.msra.gmra.mxu1 %vm103_vm1, %v1354_v15 }
 0x736   :  { %v1415_v22 = vpop.f32.mrf.mxu1 }
 0x737   :  { %v1416_v24 = vadd.f32 %v1604_v21, %v1415_v22 }
 0x738   :  { %v1801_v23 = vpop.f32.mrf.mxu1 }
 0x739   :  { %v1422_v20 = vmax.f32 %v1416_v24, 0.0 }
 0x73a   :  { %v1418_v25 = vpop.f32.mrf.mxu1 }
 0x73b   :  { %v1419_v27 = vadd.f32 %v1604_v21, %v1418_v25 }
 0x73c   :  { %v1802_v28 = vpop.f32.mrf.mxu1 }
 0x73d   :  { %v1423_v14 = vmax.f32 %v1419_v27, 0.0 }
 0x73f   :  { %v1424_v29 = vpack.c.bf16 %v1423_v14, %v1422_v20 }
 0x741   :  { %1812 = vmatmul.mubr.msk.bf16.vlgmr.msra.gmra.mxu0 %vm1464_vm4, %v1424_v29 }
 0x801   :  { %v1502_v26 = vpop.f32.mrf.mxu0 }
 0x802   :  { %v1503_v30 = vadd.f32 %v1608_v0, %v1502_v26 }
 0x803   :  { %v1813_v18 = vpop.f32.mrf.mxu0 }
 0x804   :  { %v1509_v31 = vadd.f32 %v1503_v30, %v1352_v11 }
 0x805   :  { %v1505_v32 = vpop.f32.mrf.mxu0 }
 0x806   :  { %v1506_v33 = vadd.f32 %v1608_v0, %v1505_v32  ;;  %v1513_v34 = vsel %vm103_vm1, %v1509_v31, 0.0 }
 0x807   :  { %1514 = vadd.xlane.f32.xlu0 %v1513_v34  ;;  %v1814_v35 = vpop.f32.mrf.mxu0 }
 0x808   :  { %v1510_v36 = vadd.f32 %v1506_v33, %v1353_v12 }
 0x80a   :  { %v1516_v37 = vsel %vm103_vm1, %v1510_v36, 0.0 }
 0x80b   :  { %1517 = vadd.xlane.f32.xlu1 %v1516_v37 }
 0x890   :  { %v1515_v13 = vpop.xlane.xlu0 %1514 }
 0x891   :  { %v1519_v38 = vmul.f32 0.03125, %v1515_v13 }
 0x893   :  { %v1521_v39 = vsub.f32 %v1509_v31, %v1519_v38 }
 0x894   :  { %v1518_v40 = vpop.xlane.xlu1 %1517 }
 0x895   :  { %v1520_v41 = vmul.f32 0.03125, %v1518_v40  ;;  %v1523_v42 = vmul.f32 %v1521_v39, %v1521_v39 }
 0x897   :  { %v1522_v43 = vsub.f32 %v1510_v36, %v1520_v41  ;;  %v1525_v44 = vsel %vm103_vm1, %v1523_v42, 0.0 }
 0x898   :  { %1526 = vadd.xlane.f32.xlu0 %v1525_v44 }
 0x899   :  { %v1524_v45 = vmul.f32 %v1522_v43, %v1522_v43 }
 0x89b   :  { %v1528_v46 = vsel %vm103_vm1, %v1524_v45, 0.0 }
 0x89c   :  { %1529 = vadd.xlane.f32.xlu1 %v1528_v46 }
 0x921   :  { %v1527_v47 = vpop.xlane.xlu0 %1526 }
 0x922   :  { %v1531_v48 = vmul.f32 0.03125, %v1527_v47 }
 0x924   :  { %v1533_v49 = vadd.f32 1e-05, %v1531_v48 }
 0x925   :  { %v1530_v50 = vpop.xlane.xlu1 %1529 }
 0x926   :  { %1935 = vrsqrt.f32 %v1533_v49  ;;  %v1532_v51 = vmul.f32 0.03125, %v1530_v50 }
 0x928   :  { %v1534_v52 = vadd.f32 1e-05, %v1532_v51 }
 0x92a   :  { %1937 = vrsqrt.f32 %v1534_v52 }
 0x933   :  { %v1936_v53 = vpop.eup %1935 }
 0x934   :  { %v1537_v3 = vmul.f32 %v1936_v53, %v1521_v39 }
 0x936   :  { %v1545_v56 = vmul.f32 %v1614_v54, %v1537_v3 }
 0x937   :  { %v1938_v4 = vpop.eup %1937 }
 0x938   :  { %v1538_v57 = vmul.f32 %v1938_v4, %v1522_v43  ;;  %v1553_v58 = vadd.f32 %v1615_v55, %v1545_v56 }
 0x93a   :  { %v1546_v59 = vmul.f32 %v1614_v54, %v1538_v57  ;;  %1555 = vst.msk [vmem:[#allocation7] sm:$0xff] %vm103_vm1, %v1553_v58 }
 0x93c   :  { %v1554_v60 = vadd.f32 %v1615_v55, %v1546_v59 }
 0x93e   :  { %1556 = vst.msk [vmem:[#allocation7 + $0x8] sm:$0xff] %vm103_vm1, %v1554_v60 }
 0x93f   :  { %1990 = shalt.err (!%p1987_p0)
}
 0x940   :  { %s2024_s12 = smov 128   ;;  %s2025_s13 = smov 8  }
 0x941   :  { %1568 = dma.vmem_to_hbm [thread:$0]  %s1563_s6, 256, %s2398_s14, [#allocation4], %s2024_s12, %s2024_s12, %s2025_s13  }
 0x942   :  { %2003 = dma.done.wait [#allocation4], 256  }
 0x943   :  { %2004 = vsyncadd [#allocation4], 4294967040 }
 0x944   :  { %1572 = vsyncpa [#allocation3], 1 }
 0x945   :  { %1573 = vsyncpa [#allocation6], 1 }
 0x946   :  { %1574 = vsyncpa [#allocation4], 1 }

// kernel: tpu_custom_call.1
= control target key start
LH: loop header
LB: loop body
LE: loop exit
PB: predicated region body
PF: predicated region fallthrough
CT: control target
= control target key end

     0   :  { %19 = vsyncpa [#allocation3], 0  ;;  %s2384_s0 = inlined_call_operand.vmem [shape: f32[16,32], index: 0, kind: input, shape index: {}]   ;;  %s2385_s1 = inlined_call_operand.hbm [shape: f32[2,1,8], index: 1, kind: input, shape index: {}]   ;;  %s2386_s2 = inlined_call_operand.vmem [shape: bf16[32,96], index: 2, kind: input, shape index: {}]   ;;  %s2387_s3 = inlined_call_operand.vmem [shape: f32[1,96], index: 3, kind: input, shape index: {}]   ;;  %s2388_s4 = inlined_call_operand.vmem [shape: bf16[4,8,32], index: 4, kind: input, shape index: {}]   ;;  %s2389_s5 = inlined_call_operand.vmem [shape: f32[1,32], index: 5, kind: input, shape index: {}]   ;;  %s2390_s6 = inlined_call_operand.hbm [shape: bf16[32,64], index: 6, kind: input, shape index: {}]   ;;  %s2391_s7 = inlined_call_operand.vmem [shape: f32[1,64], index: 7, kind: input, shape index: {}]   ;;  %s2392_s8 = inlined_call_operand.vmem [shape: bf16[64,32], index: 8, kind: input, shape index: {}]   ;;  %s2393_s9 = inlined_call_operand.vmem [shape: f32[1,32], index: 9, kind: input, shape index: {}]   ;;  %s2394_s10 = inlined_call_operand.vmem [shape: f32[1,32], index: 10, kind: input, shape index: {}]   ;;  %s2395_s11 = inlined_call_operand.vmem [shape: f32[1,32], index: 11, kind: input, shape index: {}]   ;;  %s2396_s12 = inlined_call_operand.vmem [shape: f32[1,32], index: 12, kind: input, shape index: {}]   ;;  %s2397_s13 = inlined_call_operand.vmem [shape: f32[1,32], index: 13, kind: input, shape index: {}]   ;;  %s2398_s14 = inlined_call_operand.hbm [shape: f32[16,32], index: 14, kind: output, shape index: {}]  }
   0x1   :  { %20 = vsyncpa [#allocation6], 0 }
   0x2   :  { %21 = vsyncpa [#allocation4], 0  ;;  %s2005_s29 = smov [#allocation2]  }
   0x3   :  { %s29_s30 = sshll.u32 %s2005_s29, 4  ;;  %s30_s30 = int_to_ptr.vmem [resolvable:$true] %s29_s30 }
   0x4   :  { %s1947_s15 = scalar_lea.vmem %s30_s30, 32  ;;  %p1952_p1 = scmp.lt.s32.totalorder %s30_s30, %s30_s30 }
   0x5   :  { %p1948_p0 = scmp.ne.s32.totalorder %s30_s30, %s1947_s15  ;;  %p1953_p2 = scmp.lt.s32.totalorder %s1947_s15, %s1947_s15 }
   0x7   :  { %p1954_p3 = por %p1953_p2, %p1952_p1 }
   0x9   :  { %p1955_p4 = pnand %p1954_p3, %p1948_p0 }
   0xb   :  { %1958 = shalt.err (!%p1955_p4)
}
   0xc   :  { %s2006_s16 = smov 16   ;;  %s2007_s17 = smov 1  }
   0xd   :  { %35 = dma.hbm_to_vmem [thread:$0]  %s2385_s1, 32, %s30_s30, [#allocation3], %s2006_s16, %s2006_s16, %s2007_s17  }
   0xe   :  { %s2008_s20 = smov [#allocation5]  }
   0xf   :  { %s49_s21 = sshll.u32 %s2008_s20, 4  ;;  %s50_s21 = int_to_ptr.vmem [resolvable:$true] %s49_s21 }
  0x10   :  { %s1967_s22 = scalar_lea.vmem %s50_s21, 256  ;;  %p1972_p6 = scmp.lt.s32.totalorder %s50_s21, %s50_s21 }
  0x11   :  { %p1968_p5 = scmp.ne.s32.totalorder %s50_s21, %s1967_s22  ;;  %p1973_p7 = scmp.lt.s32.totalorder %s1967_s22, %s1967_s22 }
  0x13   :  { %p1974_p8 = por %p1973_p7, %p1972_p6 }
  0x15   :  { %p1975_p9 = pnand %p1974_p8, %p1968_p5 }
  0x17   :  { %1978 = shalt.err (!%p1975_p9)
}
  0x18   :  { %s2009_s23 = smov 64   ;;  %s2010_s24 = smov 4  }
  0x19   :  { %55 = dma.hbm_to_vmem [thread:$0]  %s2390_s6, 256, %s50_s21, [#allocation6], %s2009_s23, %s2009_s23, %s2010_s24  }
  0x1a   :  { %1999 = dma.done.wait [#allocation3], 32  }
  0x1b   :  { %2000 = vsyncadd [#allocation3], 4294967264 }
  0x1c   :  { %2001 = dma.done.wait [#allocation6], 256  }
  0x1d   :  { %2002 = vsyncadd [#allocation6], 4294967040  ;;  %v2011_v0 = vmov 0.0   ;;  %vm2012_vm0 = vmmov 0   ;;  %v1891_v1 = vld [vmem:[%s2386_s2 + $0x8] sm:$0xff]   ;;  %v1892_v2 = vld [vmem:[%s2386_s2] sm:$0xff]  }
  0x1e   :  { %1667 = vmatprep.subr.bf16.mxu1 %v2011_v0  ;;  %1671 = vmatprep.mubr.msk.bf16.mxu1 %vm2012_vm0, %v2011_v0  ;;  %v2124_v3 = vld [vmem:[%s2384_s0] sm:$0xff]  ;;  %v2129_v4 = vld [vmem:[%s2384_s0 + $0x8] sm:$0xff]  ;;  %vm103_vm1 = vcmask 261120   ;;  %s2013_s0 = smov 120   ;;  %s2014_s18 = smov 96   ;;  %vm254_vm2 = vcmask 64512  }
  0x1f   :  { %1681 = vmatprep.subr.bf16.mxu0 %v2011_v0  ;;  %1683 = vmatprep.mubr.msk.bf16.mxu0 %vm2012_vm0, %v2011_v0  ;;  %v79_v5 = vpack.c.bf16 %v2129_v4, %v2124_v3  ;;  %v1575_v7 = vld [vmem:[%s2387_s3] ss:$0 sm:$0xff]  ;;  %s2015_s19 = smov 80   ;;  %s2016_s20 = smov 88   ;;  %v1580_v60 = vld [vmem:[#allocation2 + $0x1] ss:$0 sm:$0xff] }
  0x20   :  { %1668 = vmatpush3.bf16.msra.mxu1 %v1891_v1  ;;  %s2017_s3 = smov 72   ;;  %s2018_s21 = smov 112   ;;  %v1579_v59 = vld [vmem:[#allocation2] ss:$0 sm:$0xff]  ;;  %vm722_vm3 = vcmask 1043456   ;;  %vm1464_vm4 = vcmask 523264  }
  0x21   :  { %1669 = vmatprep.subr.bf16.mxu1 %v2011_v0  ;;  %s2019_s22 = smov 104   ;;  %s2020_s24 = smov 56  }
  0x22   :  { %s2022_s25 = smov 40   ;;  %s2023_s27 = smov [#allocation7]  }
  0x23   :  { %s1562_s6 = sshll.u32 %s2023_s27, 4  ;;  %s1563_s6 = int_to_ptr.vmem [resolvable:$true] %s1562_s6 }
  0x24   :  { %1670 = vmatpush3.bf16.msra.mxu1 %v1892_v2  ;;  %s1979_s28 = scalar_lea.vmem %s1563_s6, 256  ;;  %p1984_p11 = scmp.lt.s32.totalorder %s1563_s6, %s1563_s6 }
  0x25   :  { %1675 = vmatprep.subr.bf16.mxu1 %v2011_v0  ;;  %p1980_p10 = scmp.ne.s32.totalorder %s1563_s6, %s1979_s28  ;;  %p1985_p12 = scmp.lt.s32.totalorder %s1979_s28, %s1979_s28 }
  0x27   :  { %1672 = vmatmul.mubr.msk.bf16.vlgmr.msra.gmra.mxu1 %vm103_vm1, %v79_v5  ;;  %p1986_p13 = por %p1985_p12, %p1984_p11 }
  0x28   :  { %1677 = vmatprep.mubr.msk.bf16.mxu1 %vm2012_vm0, %v2011_v0 }
  0x29   :  { %p1987_p0 = pnand %p1986_p13, %p1980_p10 }
  0xe7   :  { %v141_v6 = vpop.f32.mrf.mxu1 }
  0xe8   :  { %v142_v10 = vadd.f32 %v1575_v7, %v141_v6 }
  0xe9   :  { %v1673_v8 = vpop.f32.mrf.mxu1 }
  0xea   :  { %v216_v28 = vpack.c.bf16 %v142_v10, %v142_v10 }
  0xeb   :  { %v144_v9 = vpop.f32.mrf.mxu1 }
  0xec   :  { %v145_v11 = vadd.f32 %v1575_v7, %v144_v9 }
  0xed   :  { %v1674_v12 = vpop.f32.mrf.mxu1 }
  0xee   :  { %v2141_v13 = vpack.i.bf16 %v145_v11, %v142_v10  ;;  %v217_v29 = vpack.c.bf16 %v145_v11, %v145_v11 }
  0xf0   :  { %1847 = vrot.lane.b32.xlu1 %v2141_v13, %s2013_s0  ;;  %1837 = vrot.lane.b32.xlu0 %v2141_v13, %s2014_s18 }
  0xf4   :  { %1852 = vrot.lane.b32.xlu1 %v2141_v13, %s2015_s19  ;;  %1842 = vrot.lane.b32.xlu0 %v2141_v13, %s2016_s20 }
  0xf8   :  { %1862 = vrot.lane.b32.xlu1 %v2141_v13, %s2017_s3  ;;  %1857 = vrot.lane.b32.xlu0 %v2141_v13, %s2018_s21 }
  0xfc   :  { %1867 = vrot.lane.b32.xlu0 %v2141_v13, %s2019_s22 }
 0x162   :  { %v1838_v14 = vpop.permute.xlu0 %1837  ;;  %v1848_v20 = vpop.permute.xlu1 %1847 }
 0x163   :  { %v1840_v15 = vunpack.i.h.bf16 %v1838_v14  ;;  %v1839_v16 = vunpack.i.l.bf16 %v1838_v14  ;;  %v1849_v34 = vunpack.i.l.bf16 %v1848_v20  ;;  %v1850_v35 = vunpack.i.h.bf16 %v1848_v20 }
 0x165   :  { %v225_v17 = vpack.c.bf16 %v1840_v15, %v1840_v15  ;;  %v224_v18 = vpack.c.bf16 %v1839_v16, %v1839_v16  ;;  %v218_v39 = vpack.c.bf16 %v1849_v34, %v1849_v34  ;;  %v219_v40 = vpack.c.bf16 %v1850_v35, %v1850_v35 }
 0x166   :  { %v1843_v19 = vpop.permute.xlu0 %1842  ;;  %v1853_v26 = vpop.permute.xlu1 %1852 }
 0x167   :  { %v1844_v21 = vunpack.i.l.bf16 %v1843_v19  ;;  %v259_v22 = vsel %vm254_vm2, %v224_v18, 0  ;;  %v305_v23 = vsel %vm254_vm2, %v225_v17, 0  ;;  %v1845_v24 = vunpack.i.h.bf16 %v1843_v19 }
 0x168   :  { %1676 = vmatpush3.bf16.xpose.msra.mxu1 %v259_v22  ;;  %1682 = vmatpush3.bf16.xpose.msra.mxu0 %v305_v23  ;;  %v1854_v30 = vunpack.i.l.bf16 %v1853_v26  ;;  %v1855_v32 = vunpack.i.h.bf16 %v1853_v26 }
 0x169   :  { %1687 = vmatprep.subr.bf16.mxu1 %v2011_v0  ;;  %1693 = vmatprep.subr.bf16.mxu0 %v2011_v0  ;;  %v226_v25 = vpack.c.bf16 %v1844_v21, %v1844_v21  ;;  %v227_v27 = vpack.c.bf16 %v1845_v24, %v1845_v24 }
 0x16a   :  { %v228_v36 = vpack.c.bf16 %v1854_v30, %v1854_v30  ;;  %v229_v37 = vpack.c.bf16 %v1855_v32, %v1855_v32  ;;  %v1863_v38 = vpop.permute.xlu1 %1862  ;;  %v1858_v41 = vpop.permute.xlu0 %1857 }
 0x16b   :  { %v351_v31 = vsel %vm254_vm2, %v226_v25, 0  ;;  %v397_v33 = vsel %vm254_vm2, %v227_v27, 0  ;;  %v1864_v42 = vunpack.i.l.bf16 %v1863_v38  ;;  %v1865_v44 = vunpack.i.h.bf16 %v1863_v38 }
 0x16c   :  { %v443_v43 = vsel %vm254_vm2, %v228_v36, 0  ;;  %v489_v45 = vsel %vm254_vm2, %v229_v37, 0  ;;  %v1859_v46 = vunpack.i.l.bf16 %v1858_v41  ;;  %v1860_v47 = vunpack.i.h.bf16 %v1858_v41 }
 0x16d   :  { %v230_v48 = vpack.c.bf16 %v1864_v42, %v1864_v42  ;;  %v231_v49 = vpack.c.bf16 %v1865_v44, %v1865_v44 }
 0x16e   :  { %v220_v50 = vpack.c.bf16 %v1859_v46, %v1859_v46  ;;  %v221_v51 = vpack.c.bf16 %v1860_v47, %v1860_v47  ;;  %v1868_v52 = vpop.permute.xlu0 %1867 }
 0x16f   :  { %1678 = vmatmul.mubr.msk.bf16.vlgmr.msra.gmra.mxu1 %vm254_vm2, %v216_v28  ;;  %1684 = vmatmul.mubr.msk.bf16.vlgmr.msra.gmra.mxu0 %vm254_vm2, %v217_v29  ;;  %v535_v53 = vsel %vm254_vm2, %v230_v48, 0  ;;  %v581_v54 = vsel %vm254_vm2, %v231_v49, 0  ;;  %v1869_v55 = vunpack.i.l.bf16 %v1868_v52  ;;  %v1870_v56 = vunpack.i.h.bf16 %v1868_v52 }
 0x170   :  { %1688 = vmatpush3.bf16.xpose.msra.mxu1 %v351_v31  ;;  %1694 = vmatpush3.bf16.xpose.msra.mxu0 %v397_v33 }
 0x171   :  { %1689 = vmatprep.mubr.msk.bf16.mxu1 %vm2012_vm0, %v2011_v0  ;;  %1695 = vmatprep.mubr.msk.bf16.mxu0 %vm2012_vm0, %v2011_v0  ;;  %v222_v57 = vpack.c.bf16 %v1869_v55, %v1869_v55  ;;  %v223_v58 = vpack.c.bf16 %v1870_v56, %v1870_v56 }
 0x172   :  { %1699 = vmatprep.subr.bf16.mxu1 %v2011_v0  ;;  %1705 = vmatprep.subr.bf16.mxu0 %v2011_v0 }
 0x177   :  { %1690 = vmatmul.mubr.msk.bf16.vlgmr.msra.gmra.mxu1 %vm254_vm2, %v218_v39  ;;  %1696 = vmatmul.mubr.msk.bf16.vlgmr.msra.gmra.mxu0 %vm254_vm2, %v219_v40 }
 0x178   :  { %1700 = vmatpush3.bf16.xpose.msra.mxu1 %v443_v43  ;;  %1706 = vmatpush3.bf16.xpose.msra.mxu0 %v489_v45 }
 0x179   :  { %1701 = vmatprep.mubr.msk.bf16.mxu1 %vm2012_vm0, %v2011_v0  ;;  %1707 = vmatprep.mubr.msk.bf16.mxu0 %vm2012_vm0, %v2011_v0 }
 0x17a   :  { %1711 = vmatprep.subr.bf16.mxu1 %v2011_v0  ;;  %1717 = vmatprep.subr.bf16.mxu0 %v2011_v0 }
 0x17f   :  { %1702 = vmatmul.mubr.msk.bf16.vlgmr.msra.gmra.mxu1 %vm254_vm2, %v220_v50  ;;  %1708 = vmatmul.mubr.msk.bf16.vlgmr.msra.gmra.mxu0 %vm254_vm2, %v221_v51 }
 0x180   :  { %1712 = vmatpush3.bf16.xpose.msra.mxu1 %v535_v53  ;;  %1718 = vmatpush3.bf16.xpose.msra.mxu0 %v581_v54 }
 0x181   :  { %1713 = vmatprep.mubr.msk.bf16.mxu1 %vm2012_vm0, %v2011_v0  ;;  %1719 = vmatprep.mubr.msk.bf16.mxu0 %vm2012_vm0, %v2011_v0 }
 0x182   :  { %1723 = vmatprep.subr.bf16.mxu1 %v2011_v0  ;;  %1729 = vmatprep.subr.bf16.mxu0 %v2011_v0 }
 0x187   :  { %1714 = vmatmul.mubr.msk.bf16.vlgmr.msra.gmra.mxu1 %vm254_vm2, %v222_v57  ;;  %1720 = vmatmul.mubr.msk.bf16.vlgmr.msra.gmra.mxu0 %vm254_vm2, %v223_v58 }
 0x188   :  { %1725 = vmatprep.mubr.msk.bf16.mxu1 %vm2012_vm0, %v2011_v0  ;;  %1731 = vmatprep.mubr.msk.bf16.mxu0 %vm2012_vm0, %v2011_v0 }
 0x22f   :  { %v295_v61 = vpop.f32.mrf.mxu1  ;;  %v341_v63 = vpop.f32.mrf.mxu0 }
 0x230   :  { %v296_v62 = vadd.f32 %v1579_v59, %v295_v61  ;;  %v342_v1 = vadd.f32 %v1580_v60, %v341_v63 }
 0x231   :  { %v1679_v2 = vpop.f32.mrf.mxu1  ;;  %v1685_v5 = vpop.f32.mrf.mxu0 }
 0x232   :  { %v623_v6 = vsel %vm254_vm2, %v296_v62, -inf  ;;  %v626_v7 = vsel %vm254_vm2, %v342_v1, -inf }
 0x233   :  { %624 = vmax.xlane.f32.xlu1 %v623_v6  ;;  %v298_v8 = vpop.f32.mrf.mxu1  ;;  %627 = vmax.xlane.f32.xlu0 %v626_v7  ;;  %v344_v9 = vpop.f32.mrf.mxu0 }
 0x235   :  { %v1680_v10 = vpop.f32.mrf.mxu1  ;;  %v1686_v11 = vpop.f32.mrf.mxu0 }
 0x237   :  { %v387_v12 = vpop.f32.mrf.mxu1  ;;  %v433_v15 = vpop.f32.mrf.mxu0 }
 0x238   :  { %v2192_v14 = vadd.f32 %v1579_v59, %v387_v12  ;;  %v434_v16 = vadd.f32 %v1580_v60, %v433_v15 }
 0x239   :  { %v1691_v17 = vpop.f32.mrf.mxu1  ;;  %v1697_v18 = vpop.f32.mrf.mxu0 }
 0x23a   :  { %v629_v19 = vsel %vm254_vm2, %v2192_v14, -inf  ;;  %v632_v20 = vsel %vm254_vm2, %v434_v16, -inf }
 0x23b   :  { %630 = vmax.xlane.f32.xlu0 %v629_v19  ;;  %v390_v21 = vpop.f32.mrf.mxu1  ;;  %v436_v22 = vpop.f32.mrf.mxu0  ;;  %633 = vmax.xlane.f32.xlu1 %v632_v20 }
 0x23d   :  { %v1692_v23 = vpop.f32.mrf.mxu1  ;;  %v1698_v24 = vpop.f32.mrf.mxu0 }
 0x23f   :  { %v479_v25 = vpop.f32.mrf.mxu1  ;;  %v525_v27 = vpop.f32.mrf.mxu0 }
 0x240   :  { %v2197_v26 = vadd.f32 %v1579_v59, %v479_v25  ;;  %v526_v28 = vadd.f32 %v1580_v60, %v525_v27 }
 0x241   :  { %v1703_v29 = vpop.f32.mrf.mxu1  ;;  %v1709_v30 = vpop.f32.mrf.mxu0 }
 0x242   :  { %v635_v31 = vsel %vm254_vm2, %v2197_v26, -inf  ;;  %v638_v32 = vsel %vm254_vm2, %v526_v28, -inf }
 0x243   :  { %636 = vmax.xlane.f32.xlu0 %v635_v31  ;;  %v482_v33 = vpop.f32.mrf.mxu1  ;;  %v528_v34 = vpop.f32.mrf.mxu0  ;;  %639 = vmax.xlane.f32.xlu1 %v638_v32 }
 0x245   :  { %v1704_v35 = vpop.f32.mrf.mxu1  ;;  %v1710_v36 = vpop.f32.mrf.mxu0 }
 0x247   :  { %v571_v37 = vpop.f32.mrf.mxu1  ;;  %v617_v39 = vpop.f32.mrf.mxu0 }
 0x248   :  { %v572_v38 = vadd.f32 %v1579_v59, %v571_v37  ;;  %v618_v40 = vadd.f32 %v1580_v60, %v617_v39 }
 0x249   :  { %v1715_v41 = vpop.f32.mrf.mxu1  ;;  %v1721_v42 = vpop.f32.mrf.mxu0 }
 0x24a   :  { %v641_v43 = vsel %vm254_vm2, %v572_v38, -inf  ;;  %v644_v44 = vsel %vm254_vm2, %v618_v40, -inf }
 0x24b   :  { %642 = vmax.xlane.f32.xlu0 %v641_v43  ;;  %v574_v45 = vpop.f32.mrf.mxu1  ;;  %v620_v46 = vpop.f32.mrf.mxu0  ;;  %645 = vmax.xlane.f32.xlu1 %v644_v44 }
 0x24d   :  { %v1716_v47 = vpop.f32.mrf.mxu1  ;;  %v1722_v48 = vpop.f32.mrf.mxu0 }
 0x2bc   :  { %v625_v49 = vpop.xlane.xlu1 %624  ;;  %v628_v50 = vpop.xlane.xlu0 %627 }
 0x2bd   :  { %v647_v51 = vsub.f32 %v296_v62, %v625_v49  ;;  %v648_v52 = vsub.f32 %v342_v1, %v628_v50 }
 0x2bf   :  { %v655_v53 = vmul.f32 1.442695, %v647_v51  ;;  %v657_v54 = vmul.f32 1.442695, %v648_v52 }
 0x2c1   :  { %1899 = vpow2.f32 %v655_v53 }
 0x2c2   :  { %1901 = vpow2.f32 %v657_v54 }
 0x2c4   :  { %v634_v55 = vpop.xlane.xlu1 %633  ;;  %v631_v58 = vpop.xlane.xlu0 %630 }
 0x2c5   :  { %v650_v56 = vsub.f32 %v434_v16, %v634_v55  ;;  %v649_v22 = vsub.f32 %v2192_v14, %v631_v58 }
 0x2c7   :  { %v661_v57 = vmul.f32 1.442695, %v650_v56  ;;  %v659_v23 = vmul.f32 1.442695, %v649_v22 }
 0x2c9   :  { %1903 = vpow2.f32 %v661_v57 }
 0x2cc   :  { %v640_v59 = vpop.xlane.xlu1 %639  ;;  %v637_v1 = vpop.xlane.xlu0 %636 }
 0x2cd   :  { %v652_v61 = vsub.f32 %v526_v28, %v640_v59  ;;  %v651_v24 = vsub.f32 %v2197_v26, %v637_v1 }
 0x2ce   :  { %v2204_v60 = vpop.eup %1899 }
 0x2cf   :  { %v2206_v63 = vpop.eup %1901  ;;  %v671_v2 = vsel %vm254_vm2, %v2204_v60, 0.0  ;;  %v665_v62 = vmul.f32 1.442695, %v652_v61  ;;  %v663_v25 = vmul.f32 1.442695, %v651_v24 }
 0x2d0   :  { %v674_v5 = vsel %vm254_vm2, %v2206_v63, 0.0  ;;  %672 = vadd.xlane.f32.xlu0 %v671_v2 }
 0x2d1   :  { %675 = vadd.xlane.f32.xlu1 %v674_v5  ;;  %1905 = vpow2.f32 %v665_v62 }
 0x2d4   :  { %v643_v6 = vpop.xlane.xlu0 %642  ;;  %v646_v7 = vpop.xlane.xlu1 %645 }
 0x2d5   :  { %v653_v8 = vsub.f32 %v572_v38, %v643_v6  ;;  %v654_v9 = vsub.f32 %v618_v40, %v646_v7 }
 0x2d6   :  { %v2212_v10 = vpop.eup %1903 }
 0x2d7   :  { %v667_v11 = vmul.f32 1.442695, %v653_v8  ;;  %v669_v12 = vmul.f32 1.442695, %v654_v9  ;;  %v680_v15 = vsel %vm254_vm2, %v2212_v10, 0.0 }
 0x2d8   :  { %681 = vadd.xlane.f32.xlu1 %v680_v15 }
 0x2d9   :  { %1907 = vpow2.f32 %v667_v11 }
 0x2da   :  { %1909 = vpow2.f32 %v669_v12 }
 0x2db   :  { %1911 = vpow2.f32 %v659_v23 }
 0x2dc   :  { %1913 = vpow2.f32 %v663_v25 }
 0x2de   :  { %v2216_v16 = vpop.eup %1905 }
 0x2df   :  { %v686_v17 = vsel %vm254_vm2, %v2216_v16, 0.0 }
 0x2e0   :  { %687 = vadd.xlane.f32.xlu1 %v686_v17 }
 0x2e6   :  { %v2220_v18 = vpop.eup %1907  ;;  %1872 = vrot.lane.b32.xlu0 %v2141_v13, %s2009_s23  ;;  %s2021_s23 = smov 48  }
 0x2e7   :  { %v689_v19 = vsel %vm254_vm2, %v2220_v18, 0.0  ;;  %v2226_v20 = vpop.eup %1909 }
 0x2e8   :  { %690 = vadd.xlane.f32.xlu1 %v689_v19  ;;  %v692_v21 = vsel %vm254_vm2, %v2226_v20, 0.0  ;;  %v2233_v27 = vpop.eup %1911 }
 0x2e9   :  { %v677_v28 = vsel %vm254_vm2, %v2233_v27, 0.0  ;;  %v2237_v29 = vpop.eup %1913 }
 0x2ea   :  { %v683_v14 = vsel %vm254_vm2, %v2237_v29, 0.0 }
 0x2ec   :  { %693 = vadd.xlane.f32.xlu1 %v692_v21 }
 0x2fd   :  { %1877 = vrot.lane.b32.xlu1 %v2141_v13, %s2020_s24 }
 0x305   :  { %678 = vadd.xlane.f32.xlu0 %v677_v28 }
 0x309   :  { %684 = vadd.xlane.f32.xlu0 %v683_v14 }
 0x31f   :  { %1882 = vrot.lane.b32.xlu0 %v2141_v13, %s2021_s23 }
 0x323   :  { %1887 = vrot.lane.b32.xlu0 %v2141_v13, %s2022_s25 }
 0x359   :  { %v673_v26 = vpop.xlane.xlu0 %672 }
 0x35a   :  { %v676_v30 = vpop.xlane.xlu1 %675  ;;  %1915 = vrcp.f32 %v673_v26 }
 0x35b   :  { %1917 = vrcp.f32 %v676_v30 }
 0x35d   :  { %v1873_v31 = vpop.permute.xlu0 %1872 }
 0x35e   :  { %v1875_v32 = vunpack.i.h.bf16 %v1873_v31  ;;  %v1874_v33 = vunpack.i.l.bf16 %v1873_v31 }
 0x360   :  { %v233_v34 = vpack.c.bf16 %v1875_v32, %v1875_v32  ;;  %v232_v35 = vpack.c.bf16 %v1874_v33, %v1874_v33  ;;  %v1094_v32 = vld [vmem:[%s2388_s4 + $0x8] sm:$0xf] }
 0x361   :  { %v682_v40 = vpop.xlane.xlu1 %681 }
 0x362   :  { %v724_v36 = vsel %vm722_vm3, %v232_v35, 0  ;;  %v770_v37 = vsel %vm722_vm3, %v233_v34, 0  ;;  %1919 = vrcp.f32 %v682_v40 }
 0x363   :  { %1724 = vmatpush3.bf16.msra.mxu1 %v724_v36  ;;  %1730 = vmatpush3.bf16.msra.mxu0 %v770_v37  ;;  %v1194_v37 = vsel %vm722_vm3, %v1094_v32, 0 }
 0x364   :  { %1735 = vmatprep.subr.bf16.mxu1 %v2011_v0  ;;  %1741 = vmatprep.subr.bf16.mxu0 %v2011_v0 }
 0x367   :  { %v1916_v13 = vpop.eup %1915 }
 0x368   :  { %v1918_v38 = vpop.eup %1917  ;;  %v703_v39 = vmul.f32 %v1916_v13, %v2204_v60 }
 0x369   :  { %v704_v41 = vmul.f32 %v1918_v38, %v2206_v63  ;;  %v688_v44 = vpop.xlane.xlu1 %687 }
 0x36a   :  { %v711_v42 = vpack.c.bf16 %v703_v39, %v703_v39  ;;  %1921 = vrcp.f32 %v688_v44 }
 0x36b   :  { %v712_v43 = vpack.c.bf16 %v704_v41, %v704_v41 }
 0x36c   :  { %1726 = vmatmul.mubr.msk.bf16.vlgmr.msra.gmra.mxu1 %vm254_vm2, %v711_v42 }
 0x36d   :  { %1732 = vmatmul.mubr.msk.bf16.vlgmr.msra.gmra.mxu0 %vm254_vm2, %v712_v43  ;;  %1737 = vmatprep.mubr.msk.bf16.mxu1 %vm2012_vm0, %v2011_v0 }
 0x36e   :  { %1743 = vmatprep.mubr.msk.bf16.mxu0 %vm2012_vm0, %v2011_v0 }
 0x36f   :  { %v1920_v47 = vpop.eup %1919 }
 0x370   :  { %v706_v53 = vmul.f32 %v1920_v47, %v2212_v10  ;;  %v1095_v47 = vld [vmem:[%s2388_s4 + $0xc] sm:$0xf] }
 0x371   :  { %v691_v45 = vpop.xlane.xlu1 %690 }
 0x372   :  { %v714_v56 = vpack.c.bf16 %v706_v53, %v706_v53 }
 0x375   :  { %v694_v46 = vpop.xlane.xlu1 %693 }
 0x377   :  { %v1922_v59 = vpop.eup %1921 }
 0x378   :  { %v708_v62 = vmul.f32 %v1922_v59, %v2216_v16 }
 0x379   :  { %v1878_v48 = vpop.permute.xlu1 %1877 }
 0x37a   :  { %v1880_v49 = vunpack.i.h.bf16 %v1878_v48  ;;  %v1879_v50 = vunpack.i.l.bf16 %v1878_v48  ;;  %v716_v10 = vpack.c.bf16 %v708_v62, %v708_v62 }
 0x37c   :  { %v235_v51 = vpack.c.bf16 %v1880_v49, %v1880_v49  ;;  %v234_v52 = vpack.c.bf16 %v1879_v50, %v1879_v50 }
 0x37e   :  { %v816_v54 = vsel %vm722_vm3, %v234_v52, 0  ;;  %v862_v55 = vsel %vm722_vm3, %v235_v51, 0  ;;  %v1241_v51 = vsel %vm722_vm3, %v1095_v47, 0 }
 0x37f   :  { %1736 = vmatpush3.bf16.msra.mxu1 %v816_v54  ;;  %1742 = vmatpush3.bf16.msra.mxu0 %v862_v55 }
 0x380   :  { %1753 = vmatprep.subr.bf16.mxu0 %v2011_v0  ;;  %1747 = vmatprep.subr.bf16.mxu1 %v2011_v0 }
 0x382   :  { %1744 = vmatmul.mubr.msk.bf16.vlgmr.msra.gmra.mxu0 %vm254_vm2, %v714_v56 }
 0x383   :  { %1755 = vmatprep.mubr.msk.bf16.mxu0 %vm2012_vm0, %v2011_v0 }
 0x38e   :  { %v679_v57 = vpop.xlane.xlu0 %678 }
 0x38f   :  { %1923 = vrcp.f32 %v679_v57 }
 0x390   :  { %1925 = vrcp.f32 %v694_v46 }
 0x392   :  { %v685_v58 = vpop.xlane.xlu0 %684 }
 0x393   :  { %1927 = vrcp.f32 %v685_v58 }
 0x394   :  { %1929 = vrcp.f32 %v691_v45 }
 0x396   :  { %v1883_v60 = vpop.permute.xlu0 %1882 }
 0x397   :  { %v1885_v61 = vunpack.i.h.bf16 %v1883_v60  ;;  %v1884_v2 = vunpack.i.l.bf16 %v1883_v60 }
 0x399   :  { %v237_v63 = vpack.c.bf16 %v1885_v61, %v1885_v61  ;;  %v236_v8 = vpack.c.bf16 %v1884_v2, %v1884_v2 }
 0x39a   :  { %v1888_v1 = vpop.permute.xlu0 %1887 }
 0x39b   :  { %v1890_v5 = vunpack.i.h.bf16 %v1888_v1  ;;  %v954_v6 = vsel %vm722_vm3, %v237_v63, 0  ;;  %v1889_v19 = vunpack.i.l.bf16 %v1888_v1  ;;  %v908_v21 = vsel %vm722_vm3, %v236_v8, 0 }
 0x39c   :  { %v1924_v7 = vpop.eup %1923  ;;  %1754 = vmatpush3.bf16.msra.mxu0 %v954_v6 }
 0x39d   :  { %v239_v9 = vpack.c.bf16 %v1890_v5, %v1890_v5  ;;  %1765 = vmatprep.subr.bf16.mxu0 %v2011_v0  ;;  %v705_v11 = vmul.f32 %v1924_v7, %v2233_v27  ;;  %v1926_v12 = vpop.eup %1925  ;;  %v238_v24 = vpack.c.bf16 %v1889_v19, %v1889_v19 }
 0x39e   :  { %v710_v22 = vmul.f32 %v1926_v12, %v2226_v20 }
 0x39f   :  { %1756 = vmatmul.mubr.msk.bf16.vlgmr.msra.gmra.mxu0 %vm254_vm2, %v716_v10  ;;  %v1046_v15 = vsel %vm722_vm3, %v239_v9, 0  ;;  %v713_v16 = vpack.c.bf16 %v705_v11, %v705_v11  ;;  %v1000_v20 = vsel %vm722_vm3, %v238_v24, 0 }
 0x3a0   :  { %v1928_v17 = vpop.eup %1927  ;;  %1766 = vmatpush3.bf16.msra.mxu0 %v1046_v15  ;;  %1767 = vmatprep.mubr.msk.bf16.mxu0 %vm2012_vm0, %v2011_v0  ;;  %v718_v25 = vpack.c.bf16 %v710_v22, %v710_v22 }
 0x3a1   :  { %1738 = vmatmul.mubr.msk.bf16.vlgmr.msra.gmra.mxu1 %vm254_vm2, %v713_v16  ;;  %1777 = vmatprep.subr.bf16.mxu0 %v2011_v0  ;;  %v707_v23 = vmul.f32 %v1928_v17, %v2237_v29  ;;  %v1930_v28 = vpop.eup %1929  ;;  %v1092_v29 = vld [vmem:[%s2388_s4] sm:$0xf] }
 0x3a2   :  { %1748 = vmatpush3.bf16.msra.mxu1 %v908_v21  ;;  %1749 = vmatprep.mubr.msk.bf16.mxu1 %vm2012_vm0, %v2011_v0  ;;  %v709_v14 = vmul.f32 %v1930_v28, %v2220_v18  ;;  %v1100_v30 = vsel %vm722_vm3, %v1092_v29, 0  ;;  %v1093_v18 = vld [vmem:[%s2388_s4 + $0x4] sm:$0xf] }
 0x3a3   :  { %1759 = vmatprep.subr.bf16.mxu1 %v2011_v0  ;;  %v715_v27 = vpack.c.bf16 %v707_v23, %v707_v23  ;;  %v1147_v31 = vsel %vm722_vm3, %v1093_v18, 0 }
 0x3a4   :  { %v717_v26 = vpack.c.bf16 %v709_v14, %v709_v14 }
 0x3a7   :  { %1768 = vmatmul.mubr.msk.bf16.vlgmr.msra.gmra.mxu0 %vm254_vm2, %v718_v25 }
 0x3a8   :  { %1779 = vmatprep.mubr.msk.bf16.mxu0 %vm2012_vm0, %v2011_v0  ;;  %1778 = vmatpush3.bf16.msra.mxu0 %v1147_v31 }
 0x3a9   :  { %1750 = vmatmul.mubr.msk.bf16.vlgmr.msra.gmra.mxu1 %vm254_vm2, %v715_v27  ;;  %1789 = vmatprep.subr.bf16.mxu0 %v2011_v0 }
 0x3aa   :  { %1760 = vmatpush3.bf16.msra.mxu1 %v1000_v20  ;;  %1761 = vmatprep.mubr.msk.bf16.mxu1 %vm2012_vm0, %v2011_v0 }
 0x3ab   :  { %1771 = vmatprep.subr.bf16.mxu1 %v2011_v0 }
 0x3b1   :  { %1762 = vmatmul.mubr.msk.bf16.vlgmr.msra.gmra.mxu1 %vm254_vm2, %v717_v26 }
 0x3b2   :  { %1772 = vmatpush3.bf16.msra.mxu1 %v1100_v30  ;;  %1773 = vmatprep.mubr.msk.bf16.mxu1 %vm2012_vm0, %v2011_v0 }
 0x3b3   :  { %1783 = vmatprep.subr.bf16.mxu1 %v2011_v0 }
 0x42c   :  { %v760_v33 = vpop.f32.mrf.mxu1 }
 0x42d   :  { %v806_v34 = vpop.f32.mrf.mxu0 }
 0x42e   :  { %v1088_v35 = vpack.c.bf16 %v806_v34, %v760_v33  ;;  %v1727_v36 = vpop.f32.mrf.mxu1  ;;  %v1601_v33 = vld [vmem:[%s2389_s5] ss:$0 sm:$0xff] }
 0x42f   :  { %v1733_v13 = vpop.f32.mrf.mxu0 }
 0x430   :  { %1774 = vmatmul.mubr.msk.bf16.vlgmr.msra.gmra.mxu1 %vm254_vm2, %v1088_v35  ;;  %v763_v38 = vpop.f32.mrf.mxu1 }
 0x431   :  { %v809_v39 = vpop.f32.mrf.mxu0  ;;  %1784 = vmatpush3.bf16.msra.mxu1 %v1194_v37  ;;  %1785 = vmatprep.mubr.msk.bf16.mxu1 %vm2012_vm0, %v2011_v0 }
 0x432   :  { %v1728_v40 = vpop.f32.mrf.mxu1  ;;  %1795 = vmatprep.subr.bf16.mxu1 %v2011_v0 }
 0x433   :  { %v1734_v41 = vpop.f32.mrf.mxu0 }
 0x442   :  { %v898_v42 = vpop.f32.mrf.mxu0 }
 0x444   :  { %v1745_v43 = vpop.f32.mrf.mxu0 }
 0x446   :  { %v901_v44 = vpop.f32.mrf.mxu0 }
 0x448   :  { %v1746_v45 = vpop.f32.mrf.mxu0 }
 0x45f   :  { %v990_v46 = vpop.f32.mrf.mxu0 }
 0x461   :  { %v852_v48 = vpop.f32.mrf.mxu1  ;;  %v1757_v49 = vpop.f32.mrf.mxu0 }
 0x462   :  { %v1089_v50 = vpack.c.bf16 %v898_v42, %v852_v48 }
 0x463   :  { %v1739_v52 = vpop.f32.mrf.mxu1  ;;  %v993_v53 = vpop.f32.mrf.mxu0 }
 0x464   :  { %1780 = vmatmul.mubr.msk.bf16.vlgmr.msra.gmra.mxu0 %vm254_vm2, %v1089_v50 }
 0x465   :  { %v855_v54 = vpop.f32.mrf.mxu1  ;;  %v1758_v55 = vpop.f32.mrf.mxu0  ;;  %1790 = vmatpush3.bf16.msra.mxu0 %v1241_v51  ;;  %1791 = vmatprep.mubr.msk.bf16.mxu0 %vm2012_vm0, %v2011_v0 }
 0x466   :  { %1803 = vmatprep.subr.bf16.mxu0 %v2011_v0 }
 0x467   :  { %v1740_v56 = vpop.f32.mrf.mxu1  ;;  %v1082_v57 = vpop.f32.mrf.mxu0 }
 0x468   :  { %v1893_v56 = vld [vmem:[#allocation5 + $0x8] sm:$0xff]  }
 0x469   :  { %v944_v58 = vpop.f32.mrf.mxu1  ;;  %v1769_v59 = vpop.f32.mrf.mxu0 }
 0x46a   :  { %v1090_v60 = vpack.c.bf16 %v990_v46, %v944_v58 }
 0x46b   :  { %v1751_v61 = vpop.f32.mrf.mxu1  ;;  %v1085_v63 = vpop.f32.mrf.mxu0 }
 0x46c   :  { %1786 = vmatmul.mubr.msk.bf16.vlgmr.msra.gmra.mxu1 %vm254_vm2, %v1090_v60 }
 0x46d   :  { %v947_v2 = vpop.f32.mrf.mxu1  ;;  %v1770_v62 = vpop.f32.mrf.mxu0  ;;  %1799 = vmatprep.mubr.msk.bf16.mxu1 %vm2012_vm0, %v2011_v0  ;;  %1796 = vmatpush3.bf16.msra.mxu1 %v1893_v56 }
 0x46e   :  { %1797 = vmatprep.subr.bf16.mxu1 %v2011_v0 }
 0x46f   :  { %v1752_v1 = vpop.f32.mrf.mxu1 }
 0x471   :  { %v1036_v5 = vpop.f32.mrf.mxu1 }
 0x472   :  { %v1091_v6 = vpack.c.bf16 %v1082_v57, %v1036_v5  ;;  %v1895_v57 = vld [vmem:[%s2392_s8 + $0x18] sm:$0xff]   ;;  %v1602_v5 = vld [vmem:[%s2394_s10] ss:$0 sm:$0xff] }
 0x473   :  { %v1763_v7 = vpop.f32.mrf.mxu1 }
 0x474   :  { %1792 = vmatmul.mubr.msk.bf16.vlgmr.msra.gmra.mxu0 %vm254_vm2, %v1091_v6 }
 0x475   :  { %v1039_v8 = vpop.f32.mrf.mxu1  ;;  %1811 = vmatprep.mubr.msk.bf16.mxu0 %vm2012_vm0, %v2011_v0  ;;  %1804 = vmatpush3.bf16.msra.mxu0 %v1895_v57 }
 0x476   :  { %1805 = vmatprep.subr.bf16.mxu0 %v2011_v0 }
 0x477   :  { %v1764_v9 = vpop.f32.mrf.mxu1 }
 0x478   :  { %v1603_v9 = vld [vmem:[%s2395_s11] ss:$0 sm:$0xff] }
 0x4f0   :  { %v1136_v10 = vpop.f32.mrf.mxu1 }
 0x4f1   :  { %v1284_v27 = vsel %vm103_vm1, %v1136_v10, 0.0 }
 0x4f2   :  { %v1775_v11 = vpop.f32.mrf.mxu1 }
 0x4f4   :  { %v1139_v12 = vpop.f32.mrf.mxu1 }
 0x4f5   :  { %v1291_v18 = vsel %vm103_vm1, %v1139_v12, 0.0 }
 0x4f6   :  { %v1776_v15 = vpop.f32.mrf.mxu1 }
 0x524   :  { %v1183_v16 = vpop.f32.mrf.mxu0 }
 0x525   :  { %v1285_v24 = vsel %vm103_vm1, %v1183_v16, 0.0  ;;  %v1896_v16 = vld [vmem:[%s2392_s8 + $0x10] sm:$0xff]  }
 0x526   :  { %v1781_v17 = vpop.f32.mrf.mxu0  ;;  %v1286_v20 = vadd.f32 %v1285_v24, %v1284_v27  ;;  %1806 = vmatpush3.bf16.msra.mxu0 %v1896_v16 }
 0x527   :  { %1807 = vmatprep.subr.bf16.mxu0 %v2011_v0  ;;  %v1897_v17 = vld [vmem:[%s2392_s8 + $0x8] sm:$0xff]  }
 0x528   :  { %v1186_v19 = vpop.f32.mrf.mxu0 }
 0x529   :  { %v1292_v29 = vsel %vm103_vm1, %v1186_v19, 0.0  ;;  %v1898_v19 = vld [vmem:[%s2392_s8] sm:$0xff]  }
 0x52a   :  { %v1782_v21 = vpop.f32.mrf.mxu0  ;;  %v1293_v34 = vadd.f32 %v1292_v29, %v1291_v18  ;;  %1808 = vmatpush3.bf16.msra.mxu0 %v1897_v17 }
 0x52b   :  { %1809 = vmatprep.subr.bf16.mxu0 %v2011_v0  ;;  %v1604_v21 = vld [vmem:[%s2391_s7] ss:$0 sm:$0xff] }
 0x52c   :  { %v1230_v22 = vpop.f32.mrf.mxu1  ;;  %v1608_v0 = vld [vmem:[%s2393_s9] ss:$0 sm:$0xff] }
 0x52d   :  { %v1287_v28 = vsel %vm103_vm1, %v1230_v22, 0.0 }
 0x52e   :  { %v1787_v23 = vpop.f32.mrf.mxu1  ;;  %v1288_v26 = vadd.f32 %v1287_v28, %v1286_v20  ;;  %1810 = vmatpush3.bf16.msra.mxu0 %v1898_v19 }
 0x530   :  { %v1233_v25 = vpop.f32.mrf.mxu1 }
 0x531   :  { %v1294_v31 = vsel %vm103_vm1, %v1233_v25, 0.0 }
 0x532   :  { %v1788_v14 = vpop.f32.mrf.mxu1  ;;  %v1295_v37 = vadd.f32 %v1294_v31, %v1293_v34 }
 0x534   :  { %v1277_v30 = vpop.f32.mrf.mxu0 }
 0x535   :  { %v1289_v32 = vsel %vm103_vm1, %v1277_v30, 0.0 }
 0x536   :  { %v1290_v35 = vadd.f32 %v1289_v32, %v1288_v26  ;;  %v1793_v36 = vpop.f32.mrf.mxu0 }
 0x538   :  { %v1305_v13 = vadd.f32 %v1601_v33, %v1290_v35  ;;  %v1280_v38 = vpop.f32.mrf.mxu0 }
 0x539   :  { %v1296_v39 = vsel %vm103_vm1, %v1280_v38, 0.0 }
 0x53a   :  { %v1297_v40 = vadd.f32 %v1296_v39, %v1295_v37  ;;  %v1794_v41 = vpop.f32.mrf.mxu0  ;;  %v1307_v42 = vadd.f32 %v1305_v13, %v2124_v3 }
 0x53c   :  { %v1306_v43 = vadd.f32 %v1601_v33, %v1297_v40  ;;  %v1311_v44 = vsel %vm103_vm1, %v1307_v42, 0.0 }
 0x53d   :  { %1312 = vadd.xlane.f32.xlu1 %v1311_v44 }
 0x53e   :  { %v1308_v45 = vadd.f32 %v1306_v43, %v2129_v4  ;;  %v1894_v4 = vld [vmem:[#allocation5] sm:$0xff]  }
 0x53f   :  { %1798 = vmatpush3.bf16.msra.mxu1 %v1894_v4 }
 0x540   :  { %v1314_v46 = vsel %vm103_vm1, %v1308_v45, 0.0 }
 0x541   :  { %1315 = vadd.xlane.f32.xlu0 %v1314_v46 }
 0x5c6   :  { %v1313_v47 = vpop.xlane.xlu1 %1312 }
 0x5c7   :  { %v1318_v48 = vmul.f32 0.03125, %v1313_v47 }
 0x5c9   :  { %v1320_v49 = vsub.f32 %v1307_v42, %v1318_v48 }
 0x5ca   :  { %v1316_v50 = vpop.xlane.xlu0 %1315 }
 0x5cb   :  { %v1319_v51 = vmul.f32 0.03125, %v1316_v50  ;;  %v1322_v52 = vmul.f32 %v1320_v49, %v1320_v49 }
 0x5cd   :  { %v1321_v53 = vsub.f32 %v1308_v45, %v1319_v51  ;;  %v1324_v54 = vsel %vm103_vm1, %v1322_v52, 0.0 }
 0x5ce   :  { %1325 = vadd.xlane.f32.xlu0 %v1324_v54  ;;  %v1614_v54 = vld [vmem:[%s2396_s12] ss:$0 sm:$0xff] }
 0x5cf   :  { %v1323_v3 = vmul.f32 %v1321_v53, %v1321_v53 }
 0x5d1   :  { %v1327_v55 = vsel %vm103_vm1, %v1323_v3, 0.0 }
 0x5d2   :  { %1328 = vadd.xlane.f32.xlu1 %v1327_v55  ;;  %v1615_v55 = vld [vmem:[%s2397_s13] ss:$0 sm:$0xff] }
 0x657   :  { %v1326_v58 = vpop.xlane.xlu0 %1325 }
 0x658   :  { %v1330_v59 = vmul.f32 0.03125, %v1326_v58 }
 0x65a   :  { %v1332_v60 = vadd.f32 1e-05, %v1330_v59 }
 0x65b   :  { %v1329_v61 = vpop.xlane.xlu1 %1328 }
 0x65c   :  { %1931 = vrsqrt.f32 %v1332_v60  ;;  %v1331_v63 = vmul.f32 0.03125, %v1329_v61 }
 0x65e   :  { %v1333_v2 = vadd.f32 1e-05, %v1331_v63 }
 0x660   :  { %1933 = vrsqrt.f32 %v1333_v2 }
 0x669   :  { %v1932_v62 = vpop.eup %1931 }
 0x66a   :  { %v1336_v1 = vmul.f32 %v1932_v62, %v1320_v49 }
 0x66c   :  { %v1344_v8 = vmul.f32 %v1602_v5, %v1336_v1 }
 0x66d   :  { %v1934_v6 = vpop.eup %1933 }
 0x66e   :  { %v1337_v7 = vmul.f32 %v1934_v6, %v1321_v53  ;;  %v1352_v11 = vadd.f32 %v1603_v9, %v1344_v8 }
 0x670   :  { %v1345_v10 = vmul.f32 %v1602_v5, %v1337_v7 }
 0x672   :  { %v1353_v12 = vadd.f32 %v1603_v9, %v1345_v10 }
 0x674   :  { %v1354_v15 = vpack.c.bf16 %v1353_v12, %v1352_v11 }
 0x676   :  { %1800 = vmatmul.mubr.msk.bf16.vlgmr.msra.gmra.mxu1 %vm103_vm1, %v1354_v15 }
 0x736   :  { %v1415_v22 = vpop.f32.mrf.mxu1 }
 0x737   :  { %v1416_v24 = vadd.f32 %v1604_v21, %v1415_v22 }
 0x738   :  { %v1801_v23 = vpop.f32.mrf.mxu1 }
 0x739   :  { %v1422_v20 = vmax.f32 %v1416_v24, 0.0 }
 0x73a   :  { %v1418_v25 = vpop.f32.mrf.mxu1 }
 0x73b   :  { %v1419_v27 = vadd.f32 %v1604_v21, %v1418_v25 }
 0x73c   :  { %v1802_v28 = vpop.f32.mrf.mxu1 }
 0x73d   :  { %v1423_v14 = vmax.f32 %v1419_v27, 0.0 }
 0x73f   :  { %v1424_v29 = vpack.c.bf16 %v1423_v14, %v1422_v20 }
 0x741   :  { %1812 = vmatmul.mubr.msk.bf16.vlgmr.msra.gmra.mxu0 %vm1464_vm4, %v1424_v29 }
 0x801   :  { %v1502_v26 = vpop.f32.mrf.mxu0 }
 0x802   :  { %v1503_v30 = vadd.f32 %v1608_v0, %v1502_v26 }
 0x803   :  { %v1813_v18 = vpop.f32.mrf.mxu0 }
 0x804   :  { %v1509_v31 = vadd.f32 %v1503_v30, %v1352_v11 }
 0x805   :  { %v1505_v32 = vpop.f32.mrf.mxu0 }
 0x806   :  { %v1506_v33 = vadd.f32 %v1608_v0, %v1505_v32  ;;  %v1513_v34 = vsel %vm103_vm1, %v1509_v31, 0.0 }
 0x807   :  { %1514 = vadd.xlane.f32.xlu0 %v1513_v34  ;;  %v1814_v35 = vpop.f32.mrf.mxu0 }
 0x808   :  { %v1510_v36 = vadd.f32 %v1506_v33, %v1353_v12 }
 0x80a   :  { %v1516_v37 = vsel %vm103_vm1, %v1510_v36, 0.0 }
 0x80b   :  { %1517 = vadd.xlane.f32.xlu1 %v1516_v37 }
 0x890   :  { %v1515_v13 = vpop.xlane.xlu0 %1514 }
 0x891   :  { %v1519_v38 = vmul.f32 0.03125, %v1515_v13 }
 0x893   :  { %v1521_v39 = vsub.f32 %v1509_v31, %v1519_v38 }
 0x894   :  { %v1518_v40 = vpop.xlane.xlu1 %1517 }
 0x895   :  { %v1520_v41 = vmul.f32 0.03125, %v1518_v40  ;;  %v1523_v42 = vmul.f32 %v1521_v39, %v1521_v39 }
 0x897   :  { %v1522_v43 = vsub.f32 %v1510_v36, %v1520_v41  ;;  %v1525_v44 = vsel %vm103_vm1, %v1523_v42, 0.0 }
 0x898   :  { %1526 = vadd.xlane.f32.xlu0 %v1525_v44 }
 0x899   :  { %v1524_v45 = vmul.f32 %v1522_v43, %v1522_v43 }
 0x89b   :  { %v1528_v46 = vsel %vm103_vm1, %v1524_v45, 0.0 }
 0x89c   :  { %1529 = vadd.xlane.f32.xlu1 %v1528_v46 }
 0x921   :  { %v1527_v47 = vpop.xlane.xlu0 %1526 }
 0x922   :  { %v1531_v48 = vmul.f32 0.03125, %v1527_v47 }
 0x924   :  { %v1533_v49 = vadd.f32 1e-05, %v1531_v48 }
 0x925   :  { %v1530_v50 = vpop.xlane.xlu1 %1529 }
 0x926   :  { %1935 = vrsqrt.f32 %v1533_v49  ;;  %v1532_v51 = vmul.f32 0.03125, %v1530_v50 }
 0x928   :  { %v1534_v52 = vadd.f32 1e-05, %v1532_v51 }
 0x92a   :  { %1937 = vrsqrt.f32 %v1534_v52 }
 0x933   :  { %v1936_v53 = vpop.eup %1935 }
 0x934   :  { %v1537_v3 = vmul.f32 %v1936_v53, %v1521_v39 }
 0x936   :  { %v1545_v56 = vmul.f32 %v1614_v54, %v1537_v3 }
 0x937   :  { %v1938_v4 = vpop.eup %1937 }
 0x938   :  { %v1538_v57 = vmul.f32 %v1938_v4, %v1522_v43  ;;  %v1553_v58 = vadd.f32 %v1615_v55, %v1545_v56 }
 0x93a   :  { %v1546_v59 = vmul.f32 %v1614_v54, %v1538_v57  ;;  %1555 = vst.msk [vmem:[#allocation7] sm:$0xff] %vm103_vm1, %v1553_v58 }
 0x93c   :  { %v1554_v60 = vadd.f32 %v1615_v55, %v1546_v59 }
 0x93e   :  { %1556 = vst.msk [vmem:[#allocation7 + $0x8] sm:$0xff] %vm103_vm1, %v1554_v60 }
 0x93f   :  { %1990 = shalt.err (!%p1987_p0)
}
 0x940   :  { %s2024_s12 = smov 128   ;;  %s2025_s13 = smov 8  }
 0x941   :  { %1568 = dma.vmem_to_hbm [thread:$0]  %s1563_s6, 256, %s2398_s14, [#allocation4], %s2024_s12, %s2024_s12, %s2025_s13  }
 0x942   :  { %2003 = dma.done.wait [#allocation4], 256  }
 0x943   :  { %2004 = vsyncadd [#allocation4], 4294967040 }
 0x944   :  { %1572 = vsyncpa [#allocation3], 1 }
 0x945   :  { %1573 = vsyncpa [#allocation6], 1 }
 0x946   :  { %1574 = vsyncpa [#allocation4], 1 }

</bundles_post_ra>
